<compile_context>
chip_gen: v7x
topology: tpu7x:2x2x1
jax: 0.10.0
libtpu: 0.0.40
codegen_flags: <defaults>
</compile_context>

<pallas_src>
from functools import partial

import numpy as np
import jax
import jax.numpy as jnp
from jax.experimental import pallas as pl
from jax.experimental.pallas import tpu as pltpu

PAD = 0


def bilstm_kernel(x_ref, valid_ref, wih_ref, b_ref, whh_ref,
                  w1_ref, b1_ref, w2_ref, b2_ref,
                  out_ref, gx_ref, *, T, Bp, H):
    """x_ref:    (T*Bp, 2D)   [x[t] | x[T-1-t]] per time step (flattened time-major)
       valid_ref:(T*Bp, 2H)   per-lane 0/1 mask, fwd mask in lanes [0:H], bwd in [H:2H]
       wih_ref:  (2D, 8H)     fused input weights (block-diag per gate, fwd/bwd)
       b_ref:    (1, 8H)      fused gate biases (b_ih + b_hh, both directions)
       whh_ref:  (2H, 8H)     fused recurrent weights (block-diag per gate)
       gx_ref:   (T*Bp, 8H)   VMEM scratch holding the precomputed input projections
    """
    H2 = 2 * H

    # ---- fused input projection + biases, hoisted out of the recurrence ----
    gx_ref[...] = (jnp.dot(x_ref[...], wih_ref[...],
                           preferred_element_type=jnp.float32)
                   + b_ref[...])

    whh = whh_ref[...]
    h = jnp.zeros((Bp, H2), jnp.float32)     # [h_fwd | h_bwd]
    c = jnp.zeros((Bp, H2), jnp.float32)
    acc = jnp.zeros((Bp, H2), jnp.float32)   # masked time-sum [sum_f | sum_b]

    # ---- fully unrolled recurrence; both directions processed per iteration ----
    for t in range(T):
        r0 = t * Bp
        gates = gx_ref[r0:r0 + Bp, :] + jnp.dot(
            h, whh, preferred_element_type=jnp.float32)      # (Bp, 8H)
        i_g = jax.nn.sigmoid(gates[:, 0 * H2:1 * H2])
        f_g = jax.nn.sigmoid(gates[:, 1 * H2:2 * H2])
        g_g = jnp.tanh(gates[:, 2 * H2:3 * H2])
        o_g = jax.nn.sigmoid(gates[:, 3 * H2:4 * H2])

        c_new = f_g * c + i_g * g_g
        h_new = o_g * jnp.tanh(c_new)

        m = valid_ref[r0:r0 + Bp, :]          # (Bp, 2H), 0/1 per direction
        c = c + m * (c_new - c)               # packed-seq semantics via FMA masking
        h = h + m * (h_new - h)
        acc = acc + m * h_new

    # ---- output head: tanh(Linear1) -> Linear2 (acc is already [sum_f | sum_b]) ----
    h1 = jnp.tanh(jnp.dot(acc, w1_ref[...],
                          preferred_element_type=jnp.float32) + b1_ref[...])
    y = jnp.dot(h1, w2_ref[...], preferred_element_type=jnp.float32) + b2_ref[...]
    out_ref[...] = y.astype(out_ref.dtype)


def _fuse_gate_weights(wf, wb, H):
    """Block-diagonal fuse per gate, gate-major / direction-minor column order."""
    blocks = []
    for k in range(4):
        a = wf[:, k * H:(k + 1) * H]
        b = wb[:, k * H:(k + 1) * H]
        top = jnp.concatenate([a, jnp.zeros((a.shape[0], H), jnp.float32)], axis=1)
        bot = jnp.concatenate([jnp.zeros((b.shape[0], H), jnp.float32), b], axis=1)
        blocks.append(jnp.concatenate([top, bot], axis=0))
    return jnp.concatenate(blocks, axis=1)            # (rows_f+rows_b, 8H)


def _fuse_gate_bias(bf, bb, H):
    parts = []
    for k in range(4):
        parts.append(bf[:, k * H:(k + 1) * H])
        parts.append(bb[:, k * H:(k + 1) * H])
    return jnp.concatenate(parts, axis=1)             # (1, 8H)


def bilstm_forward(ids, mask, params):
    """ids: (B, T) int32 token ids; mask: (B, T) {0,1} float32."""
    B, T = ids.shape
    D = params["emb"].shape[1]
    H = params["whh_f"].shape[0]
    Bp = max(8, ((B + 7) // 8) * 8)                   # pad batch to f32 sublane tile

    # glue (embedding gather, layout packing) done in plain JAX
    emb = params["emb"][ids]                          # (B, T, D)
    x = jnp.transpose(emb, (1, 0, 2))                 # (T, B, D) time-major
    x = jnp.pad(x, ((0, 0), (0, Bp - B), (0, 0)))     # (T, Bp, D)
    x_comb = jnp.concatenate([x, x[::-1]], axis=-1)   # (T, Bp, 2D): [x[t] | x[T-1-t]]
    x_flat = x_comb.reshape(T * Bp, 2 * D)

    lengths = mask.sum(axis=1)                        # (B,)
    t_idx = jnp.arange(T, dtype=jnp.float32)[:, None]
    vf = (t_idx < lengths[None, :]).astype(jnp.float32)   # (T, B)
    vf = jnp.pad(vf, ((0, 0), (0, Bp - B)))           # (T, Bp); padded rows -> len 0
    vb = vf[::-1]                                     # mask seen by backward direction
    valid = jnp.concatenate(
        [jnp.broadcast_to(vf[..., None], (T, Bp, H)),
         jnp.broadcast_to(vb[..., None], (T, Bp, H))], axis=-1)   # (T, Bp, 2H)
    valid_flat = valid.reshape(T * Bp, 2 * H)

    wih_fused = _fuse_gate_weights(params["wih_f"], params["wih_b"], H)   # (2D, 8H)
    whh_fused = _fuse_gate_weights(params["whh_f"], params["whh_b"], H)   # (2H, 8H)
    b_fused = _fuse_gate_bias(params["b_f"], params["b_b"], H)            # (1, 8H)

    vmem = pl.BlockSpec(memory_space=pltpu.MemorySpace.VMEM)
    args = (x_flat, valid_flat, wih_fused, b_fused, whh_fused,
            params["w1"], params["b1"], params["w2"], params["b2"])

    out = pl.pallas_call(
        partial(bilstm_kernel, T=T, Bp=Bp, H=H),
        out_shape=jax.ShapeDtypeStruct((Bp, 2), jnp.float32),
        in_specs=[vmem] * len(args),
        out_specs=vmem,
        scratch_shapes=[pltpu.VMEM((T * Bp, 8 * H), jnp.float32)],
        compiler_params=pltpu.CompilerParams(vmem_limit_bytes=16 * 1024 * 1024),
    )(*args)
    return out[:B]


def _numpy_reference(ids, mask, params):
    p = {k: np.asarray(v) for k, v in params.items()}
    ids = np.asarray(ids)
    mask = np.asarray(mask)
    B, T = ids.shape
    H = p["whh_f"].shape[0]

    def sig(x):
        return 1.0 / (1.0 + np.exp(-x))

    emb = p["emb"][ids]                      # (B, T, D)
    lengths = mask.sum(axis=1).astype(np.int32)
    out = np.zeros((B, 2 * H), np.float32)
    for b in range(B):
        L = int(lengths[b])
        # forward
        h = np.zeros(H, np.float32); c = np.zeros(H, np.float32)
        for t in range(L):
            g = emb[b, t] @ p["wih_f"] + h @ p["whh_f"] + p["b_f"][0]
            i_g, f_g, g_g, o_g = sig(g[:H]), sig(g[H:2*H]), np.tanh(g[2*H:3*H]), sig(g[3*H:])
            c = f_g * c + i_g * g_g
            h = o_g * np.tanh(c)
            out[b, :H] += h
        # backward
        h = np.zeros(H, np.float32); c = np.zeros(H, np.float32)
        for t in range(L - 1, -1, -1):
            g = emb[b, t] @ p["wih_b"] + h @ p["whh_b"] + p["b_b"][0]
            i_g, f_g, g_g, o_g = sig(g[:H]), sig(g[H:2*H]), np.tanh(g[2*H:3*H]), sig(g[3*H:])
            c = f_g * c + i_g * g_g
            h = o_g * np.tanh(c)
            out[b, H:] += h
    h1 = np.tanh(out @ p["w1"] + p["b1"][0])
    return h1 @ p["w2"] + p["b2"][0]


def make_params(key, vocab_size, word_dim, hidden_size):
    ks = jax.random.split(key, 12)
    s = 0.1
    emb = s * jax.random.normal(ks[0], (vocab_size, word_dim), jnp.float32)
    emb = emb.at[PAD].set(0.0)   # nn.Embedding padding_idx row is zero
    params = {
        "emb":   emb,
        "wih_f": s * jax.random.normal(ks[1], (word_dim, 4 * hidden_size), jnp.float32),
        "whh_f": s * jax.random.normal(ks[2], (hidden_size, 4 * hidden_size), jnp.float32),
        # b_ih + b_hh folded into a single bias per direction
        "b_f":   s * jax.random.normal(ks[3], (1, 4 * hidden_size), jnp.float32),
        "wih_b": s * jax.random.normal(ks[4], (word_dim, 4 * hidden_size), jnp.float32),
        "whh_b": s * jax.random.normal(ks[5], (hidden_size, 4 * hidden_size), jnp.float32),
        "b_b":   s * jax.random.normal(ks[6], (1, 4 * hidden_size), jnp.float32),
        "w1":    s * jax.random.normal(ks[7], (2 * hidden_size, hidden_size), jnp.float32),
        "b1":    s * jax.random.normal(ks[8], (1, hidden_size), jnp.float32),
        "w2":    s * jax.random.normal(ks[9], (hidden_size, 2), jnp.float32),
        "b2":    s * jax.random.normal(ks[10], (1, 2), jnp.float32),
    }
    return params


if __name__ == "__main__":
    B, T = 2, 8
    word_dim, hidden_size, vocab_size = 16, 32, 50

    key = jax.random.PRNGKey(0)
    k_par, k_ids = jax.random.split(key)
    params = make_params(k_par, vocab_size, word_dim, hidden_size)

    lengths = jnp.array([8, 5], dtype=jnp.int32)
    ids = jax.random.randint(k_ids, (B, T), 1, vocab_size, dtype=jnp.int32)
    t_idx = jnp.arange(T, dtype=jnp.int32)[None, :]
    mask = (t_idx < lengths[:, None]).astype(jnp.float32)
    ids = jnp.where(mask > 0, ids, PAD)   # pad token beyond each length

    y = bilstm_forward(ids, mask, params)
    y = jax.block_until_ready(y)

    y_ref = _numpy_reference(ids, mask, params)
    np.testing.assert_allclose(np.asarray(y), y_ref, atol=1e-4, rtol=1e-4)

    print("KERNEL_OK")
</pallas_src>

<mosaic_0001>
module attributes {stable_mosaic.version = 11 : i64} {
  func.func @bilstm_kernel(%arg0: memref<64x32xf32, #tpu.memory_space<vmem>>, %arg1: memref<64x64xf32, #tpu.memory_space<vmem>>, %arg2: memref<32x256xf32, #tpu.memory_space<vmem>>, %arg3: memref<1x256xf32, #tpu.memory_space<vmem>>, %arg4: memref<64x256xf32, #tpu.memory_space<vmem>>, %arg5: memref<64x32xf32, #tpu.memory_space<vmem>>, %arg6: memref<1x32xf32, #tpu.memory_space<vmem>>, %arg7: memref<32x2xf32, #tpu.memory_space<vmem>>, %arg8: memref<1x2xf32, #tpu.memory_space<vmem>>, %arg9: memref<8x2xf32, #tpu.memory_space<vmem>>, %arg10: memref<64x256xf32, #tpu.memory_space<vmem>>) attributes {dimension_semantics = [], scalar_prefetch = 0 : i64, scratch_operands = 1 : i64, tpu.core_type = #tpu.core_type<tc>} {
    %c0 = arith.constant 0 : index
    %c0_0 = arith.constant 0 : index
    %0 = vector.load %arg0[%c0, %c0_0] : memref<64x32xf32, #tpu.memory_space<vmem>>, vector<64x32xf32>
    %c0_1 = arith.constant 0 : index
    %c0_2 = arith.constant 0 : index
    %1 = vector.load %arg2[%c0_1, %c0_2] : memref<32x256xf32, #tpu.memory_space<vmem>>, vector<32x256xf32>
    %cst = arith.constant dense<0.000000e+00> : vector<64x256xf32>
    %2 = tpu.matmul %0, %1, %cst {dimension_numbers = #tpu.dot_dimension_numbers<[1], [0], [0], [1], [0, 0, 1, 1], [], []>} : vector<64x32xf32>, vector<32x256xf32>, vector<64x256xf32> -> vector<64x256xf32>
    %c0_3 = arith.constant 0 : index
    %c0_4 = arith.constant 0 : index
    %3 = vector.load %arg3[%c0_3, %c0_4] : memref<1x256xf32, #tpu.memory_space<vmem>>, vector<1x256xf32>
    %4 = vector.broadcast %3 : vector<1x256xf32> to vector<64x256xf32>
    %5 = arith.addf %2, %4 : vector<64x256xf32>
    %c0_5 = arith.constant 0 : index
    %c0_6 = arith.constant 0 : index
    %6 = vector.load %arg10[%c0_5, %c0_6] : memref<64x256xf32, #tpu.memory_space<vmem>>, vector<64x256xf32>
    tpu.vector_store %arg10[%c0_5, %c0_6], %5 {strides = array<i32>} : memref<64x256xf32, #tpu.memory_space<vmem>>, vector<64x256xf32>,
    %c0_7 = arith.constant 0 : index
    %c0_8 = arith.constant 0 : index
    %7 = vector.load %arg4[%c0_7, %c0_8] : memref<64x256xf32, #tpu.memory_space<vmem>>, vector<64x256xf32>
    %cst_9 = arith.constant 0.000000e+00 : f32
    %8 = vector.broadcast %cst_9 : f32 to vector<8x64xf32>
    %cst_10 = arith.constant 0.000000e+00 : f32
    %9 = vector.broadcast %cst_10 : f32 to vector<8x64xf32>
    %cst_11 = arith.constant 0.000000e+00 : f32
    %10 = vector.broadcast %cst_11 : f32 to vector<8x64xf32>
    %c0_12 = arith.constant 0 : index
    %c0_13 = arith.constant 0 : index
    %11 = vector.load %arg10[%c0_12, %c0_13] : memref<64x256xf32, #tpu.memory_space<vmem>>, vector<8x256xf32>
    %cst_14 = arith.constant dense<0.000000e+00> : vector<8x256xf32>
    %12 = tpu.matmul %8, %7, %cst_14 {dimension_numbers = #tpu.dot_dimension_numbers<[1], [0], [0], [1], [0, 0, 1, 1], [], []>} : vector<8x64xf32>, vector<64x256xf32>, vector<8x256xf32> -> vector<8x256xf32>
    %13 = arith.addf %11, %12 : vector<8x256xf32>
    %14 = vector.extract_strided_slice %13 {offsets = [0, 0], sizes = [8, 64], strides = [1, 1]} : vector<8x256xf32> to vector<8x64xf32>
    %15 = arith.negf %14 : vector<8x64xf32>
    %16 = math.exp %15 : vector<8x64xf32>
    %cst_15 = arith.constant 1.000000e+00 : f32
    %17 = vector.broadcast %cst_15 : f32 to vector<8x64xf32>
    %18 = arith.addf %17, %16 : vector<8x64xf32>
    %19 = arith.divf %17, %18 : vector<8x64xf32>
    %20 = vector.extract_strided_slice %13 {offsets = [0, 64], sizes = [8, 64], strides = [1, 1]} : vector<8x256xf32> to vector<8x64xf32>
    %21 = arith.negf %20 : vector<8x64xf32>
    %22 = math.exp %21 : vector<8x64xf32>
    %cst_16 = arith.constant 1.000000e+00 : f32
    %23 = vector.broadcast %cst_16 : f32 to vector<8x64xf32>
    %24 = arith.addf %23, %22 : vector<8x64xf32>
    %25 = arith.divf %23, %24 : vector<8x64xf32>
    %26 = vector.extract_strided_slice %13 {offsets = [0, 128], sizes = [8, 64], strides = [1, 1]} : vector<8x256xf32> to vector<8x64xf32>
    %27 = math.tanh %26 : vector<8x64xf32>
    %28 = vector.extract_strided_slice %13 {offsets = [0, 192], sizes = [8, 64], strides = [1, 1]} : vector<8x256xf32> to vector<8x64xf32>
    %29 = arith.negf %28 : vector<8x64xf32>
    %30 = math.exp %29 : vector<8x64xf32>
    %cst_17 = arith.constant 1.000000e+00 : f32
    %31 = vector.broadcast %cst_17 : f32 to vector<8x64xf32>
    %32 = arith.addf %31, %30 : vector<8x64xf32>
    %33 = arith.divf %31, %32 : vector<8x64xf32>
    %34 = arith.mulf %25, %9 : vector<8x64xf32>
    %35 = arith.mulf %19, %27 : vector<8x64xf32>
    %36 = arith.addf %34, %35 : vector<8x64xf32>
    %37 = math.tanh %36 : vector<8x64xf32>
    %38 = arith.mulf %33, %37 : vector<8x64xf32>
    %c0_18 = arith.constant 0 : index
    %c0_19 = arith.constant 0 : index
    %39 = vector.load %arg1[%c0_18, %c0_19] : memref<64x64xf32, #tpu.memory_space<vmem>>, vector<8x64xf32>
    %40 = arith.subf %36, %9 : vector<8x64xf32>
    %41 = arith.mulf %39, %40 : vector<8x64xf32>
    %42 = arith.addf %9, %41 : vector<8x64xf32>
    %43 = arith.subf %38, %8 : vector<8x64xf32>
    %44 = arith.mulf %39, %43 : vector<8x64xf32>
    %45 = arith.addf %8, %44 : vector<8x64xf32>
    %46 = arith.mulf %39, %38 : vector<8x64xf32>
    %47 = arith.addf %10, %46 : vector<8x64xf32>
    %c8 = arith.constant 8 : index
    %c0_20 = arith.constant 0 : index
    %48 = vector.load %arg10[%c8, %c0_20] : memref<64x256xf32, #tpu.memory_space<vmem>>, vector<8x256xf32>
    %cst_21 = arith.constant dense<0.000000e+00> : vector<8x256xf32>
    %49 = tpu.matmul %45, %7, %cst_21 {dimension_numbers = #tpu.dot_dimension_numbers<[1], [0], [0], [1], [0, 0, 1, 1], [], []>} : vector<8x64xf32>, vector<64x256xf32>, vector<8x256xf32> -> vector<8x256xf32>
    %50 = arith.addf %48, %49 : vector<8x256xf32>
    %51 = vector.extract_strided_slice %50 {offsets = [0, 0], sizes = [8, 64], strides = [1, 1]} : vector<8x256xf32> to vector<8x64xf32>
    %52 = arith.negf %51 : vector<8x64xf32>
    %53 = math.exp %52 : vector<8x64xf32>
    %cst_22 = arith.constant 1.000000e+00 : f32
    %54 = vector.broadcast %cst_22 : f32 to vector<8x64xf32>
    %55 = arith.addf %54, %53 : vector<8x64xf32>
    %56 = arith.divf %54, %55 : vector<8x64xf32>
    %57 = vector.extract_strided_slice %50 {offsets = [0, 64], sizes = [8, 64], strides = [1, 1]} : vector<8x256xf32> to vector<8x64xf32>
    %58 = arith.negf %57 : vector<8x64xf32>
    %59 = math.exp %58 : vector<8x64xf32>
    %cst_23 = arith.constant 1.000000e+00 : f32
    %60 = vector.broadcast %cst_23 : f32 to vector<8x64xf32>
    %61 = arith.addf %60, %59 : vector<8x64xf32>
    %62 = arith.divf %60, %61 : vector<8x64xf32>
    %63 = vector.extract_strided_slice %50 {offsets = [0, 128], sizes = [8, 64], strides = [1, 1]} : vector<8x256xf32> to vector<8x64xf32>
    %64 = math.tanh %63 : vector<8x64xf32>
    %65 = vector.extract_strided_slice %50 {offsets = [0, 192], sizes = [8, 64], strides = [1, 1]} : vector<8x256xf32> to vector<8x64xf32>
    %66 = arith.negf %65 : vector<8x64xf32>
    %67 = math.exp %66 : vector<8x64xf32>
    %cst_24 = arith.constant 1.000000e+00 : f32
    %68 = vector.broadcast %cst_24 : f32 to vector<8x64xf32>
    %69 = arith.addf %68, %67 : vector<8x64xf32>
    %70 = arith.divf %68, %69 : vector<8x64xf32>
    %71 = arith.mulf %62, %42 : vector<8x64xf32>
    %72 = arith.mulf %56, %64 : vector<8x64xf32>
    %73 = arith.addf %71, %72 : vector<8x64xf32>
    %74 = math.tanh %73 : vector<8x64xf32>
    %75 = arith.mulf %70, %74 : vector<8x64xf32>
    %c8_25 = arith.constant 8 : index
    %c0_26 = arith.constant 0 : index
    %76 = vector.load %arg1[%c8_25, %c0_26] : memref<64x64xf32, #tpu.memory_space<vmem>>, vector<8x64xf32>
    %77 = arith.subf %73, %42 : vector<8x64xf32>
    %78 = arith.mulf %76, %77 : vector<8x64xf32>
    %79 = arith.addf %42, %78 : vector<8x64xf32>
    %80 = arith.subf %75, %45 : vector<8x64xf32>
    %81 = arith.mulf %76, %80 : vector<8x64xf32>
    %82 = arith.addf %45, %81 : vector<8x64xf32>
    %83 = arith.mulf %76, %75 : vector<8x64xf32>
    %84 = arith.addf %47, %83 : vector<8x64xf32>
    %c16 = arith.constant 16 : index
    %c0_27 = arith.constant 0 : index
    %85 = vector.load %arg10[%c16, %c0_27] : memref<64x256xf32, #tpu.memory_space<vmem>>, vector<8x256xf32>
    %cst_28 = arith.constant dense<0.000000e+00> : vector<8x256xf32>
    %86 = tpu.matmul %82, %7, %cst_28 {dimension_numbers = #tpu.dot_dimension_numbers<[1], [0], [0], [1], [0, 0, 1, 1], [], []>} : vector<8x64xf32>, vector<64x256xf32>, vector<8x256xf32> -> vector<8x256xf32>
    %87 = arith.addf %85, %86 : vector<8x256xf32>
    %88 = vector.extract_strided_slice %87 {offsets = [0, 0], sizes = [8, 64], strides = [1, 1]} : vector<8x256xf32> to vector<8x64xf32>
    %89 = arith.negf %88 : vector<8x64xf32>
    %90 = math.exp %89 : vector<8x64xf32>
    %cst_29 = arith.constant 1.000000e+00 : f32
    %91 = vector.broadcast %cst_29 : f32 to vector<8x64xf32>
    %92 = arith.addf %91, %90 : vector<8x64xf32>
    %93 = arith.divf %91, %92 : vector<8x64xf32>
    %94 = vector.extract_strided_slice %87 {offsets = [0, 64], sizes = [8, 64], strides = [1, 1]} : vector<8x256xf32> to vector<8x64xf32>
    %95 = arith.negf %94 : vector<8x64xf32>
    %96 = math.exp %95 : vector<8x64xf32>
    %cst_30 = arith.constant 1.000000e+00 : f32
    %97 = vector.broadcast %cst_30 : f32 to vector<8x64xf32>
    %98 = arith.addf %97, %96 : vector<8x64xf32>
    %99 = arith.divf %97, %98 : vector<8x64xf32>
    %100 = vector.extract_strided_slice %87 {offsets = [0, 128], sizes = [8, 64], strides = [1, 1]} : vector<8x256xf32> to vector<8x64xf32>
    %101 = math.tanh %100 : vector<8x64xf32>
    %102 = vector.extract_strided_slice %87 {offsets = [0, 192], sizes = [8, 64], strides = [1, 1]} : vector<8x256xf32> to vector<8x64xf32>
    %103 = arith.negf %102 : vector<8x64xf32>
    %104 = math.exp %103 : vector<8x64xf32>
    %cst_31 = arith.constant 1.000000e+00 : f32
    %105 = vector.broadcast %cst_31 : f32 to vector<8x64xf32>
    %106 = arith.addf %105, %104 : vector<8x64xf32>
    %107 = arith.divf %105, %106 : vector<8x64xf32>
    %108 = arith.mulf %99, %79 : vector<8x64xf32>
    %109 = arith.mulf %93, %101 : vector<8x64xf32>
    %110 = arith.addf %108, %109 : vector<8x64xf32>
    %111 = math.tanh %110 : vector<8x64xf32>
    %112 = arith.mulf %107, %111 : vector<8x64xf32>
    %c16_32 = arith.constant 16 : index
    %c0_33 = arith.constant 0 : index
    %113 = vector.load %arg1[%c16_32, %c0_33] : memref<64x64xf32, #tpu.memory_space<vmem>>, vector<8x64xf32>
    %114 = arith.subf %110, %79 : vector<8x64xf32>
    %115 = arith.mulf %113, %114 : vector<8x64xf32>
    %116 = arith.addf %79, %115 : vector<8x64xf32>
    %117 = arith.subf %112, %82 : vector<8x64xf32>
    %118 = arith.mulf %113, %117 : vector<8x64xf32>
    %119 = arith.addf %82, %118 : vector<8x64xf32>
    %120 = arith.mulf %113, %112 : vector<8x64xf32>
    %121 = arith.addf %84, %120 : vector<8x64xf32>
    %c24 = arith.constant 24 : index
    %c0_34 = arith.constant 0 : index
    %122 = vector.load %arg10[%c24, %c0_34] : memref<64x256xf32, #tpu.memory_space<vmem>>, vector<8x256xf32>
    %cst_35 = arith.constant dense<0.000000e+00> : vector<8x256xf32>
    %123 = tpu.matmul %119, %7, %cst_35 {dimension_numbers = #tpu.dot_dimension_numbers<[1], [0], [0], [1], [0, 0, 1, 1], [], []>} : vector<8x64xf32>, vector<64x256xf32>, vector<8x256xf32> -> vector<8x256xf32>
    %124 = arith.addf %122, %123 : vector<8x256xf32>
    %125 = vector.extract_strided_slice %124 {offsets = [0, 0], sizes = [8, 64], strides = [1, 1]} : vector<8x256xf32> to vector<8x64xf32>
    %126 = arith.negf %125 : vector<8x64xf32>
    %127 = math.exp %126 : vector<8x64xf32>
    %cst_36 = arith.constant 1.000000e+00 : f32
    %128 = vector.broadcast %cst_36 : f32 to vector<8x64xf32>
    %129 = arith.addf %128, %127 : vector<8x64xf32>
    %130 = arith.divf %128, %129 : vector<8x64xf32>
    %131 = vector.extract_strided_slice %124 {offsets = [0, 64], sizes = [8, 64], strides = [1, 1]} : vector<8x256xf32> to vector<8x64xf32>
    %132 = arith.negf %131 : vector<8x64xf32>
    %133 = math.exp %132 : vector<8x64xf32>
    %cst_37 = arith.constant 1.000000e+00 : f32
    %134 = vector.broadcast %cst_37 : f32 to vector<8x64xf32>
    %135 = arith.addf %134, %133 : vector<8x64xf32>
    %136 = arith.divf %134, %135 : vector<8x64xf32>
    %137 = vector.extract_strided_slice %124 {offsets = [0, 128], sizes = [8, 64], strides = [1, 1]} : vector<8x256xf32> to vector<8x64xf32>
    %138 = math.tanh %137 : vector<8x64xf32>
    %139 = vector.extract_strided_slice %124 {offsets = [0, 192], sizes = [8, 64], strides = [1, 1]} : vector<8x256xf32> to vector<8x64xf32>
    %140 = arith.negf %139 : vector<8x64xf32>
    %141 = math.exp %140 : vector<8x64xf32>
    %cst_38 = arith.constant 1.000000e+00 : f32
    %142 = vector.broadcast %cst_38 : f32 to vector<8x64xf32>
    %143 = arith.addf %142, %141 : vector<8x64xf32>
    %144 = arith.divf %142, %143 : vector<8x64xf32>
    %145 = arith.mulf %136, %116 : vector<8x64xf32>
    %146 = arith.mulf %130, %138 : vector<8x64xf32>
    %147 = arith.addf %145, %146 : vector<8x64xf32>
    %148 = math.tanh %147 : vector<8x64xf32>
    %149 = arith.mulf %144, %148 : vector<8x64xf32>
    %c24_39 = arith.constant 24 : index
    %c0_40 = arith.constant 0 : index
    %150 = vector.load %arg1[%c24_39, %c0_40] : memref<64x64xf32, #tpu.memory_space<vmem>>, vector<8x64xf32>
    %151 = arith.subf %147, %116 : vector<8x64xf32>
    %152 = arith.mulf %150, %151 : vector<8x64xf32>
    %153 = arith.addf %116, %152 : vector<8x64xf32>
    %154 = arith.subf %149, %119 : vector<8x64xf32>
    %155 = arith.mulf %150, %154 : vector<8x64xf32>
    %156 = arith.addf %119, %155 : vector<8x64xf32>
    %157 = arith.mulf %150, %149 : vector<8x64xf32>
    %158 = arith.addf %121, %157 : vector<8x64xf32>
    %c32 = arith.constant 32 : index
    %c0_41 = arith.constant 0 : index
    %159 = vector.load %arg10[%c32, %c0_41] : memref<64x256xf32, #tpu.memory_space<vmem>>, vector<8x256xf32>
    %cst_42 = arith.constant dense<0.000000e+00> : vector<8x256xf32>
    %160 = tpu.matmul %156, %7, %cst_42 {dimension_numbers = #tpu.dot_dimension_numbers<[1], [0], [0], [1], [0, 0, 1, 1], [], []>} : vector<8x64xf32>, vector<64x256xf32>, vector<8x256xf32> -> vector<8x256xf32>
    %161 = arith.addf %159, %160 : vector<8x256xf32>
    %162 = vector.extract_strided_slice %161 {offsets = [0, 0], sizes = [8, 64], strides = [1, 1]} : vector<8x256xf32> to vector<8x64xf32>
    %163 = arith.negf %162 : vector<8x64xf32>
    %164 = math.exp %163 : vector<8x64xf32>
    %cst_43 = arith.constant 1.000000e+00 : f32
    %165 = vector.broadcast %cst_43 : f32 to vector<8x64xf32>
    %166 = arith.addf %165, %164 : vector<8x64xf32>
    %167 = arith.divf %165, %166 : vector<8x64xf32>
    %168 = vector.extract_strided_slice %161 {offsets = [0, 64], sizes = [8, 64], strides = [1, 1]} : vector<8x256xf32> to vector<8x64xf32>
    %169 = arith.negf %168 : vector<8x64xf32>
    %170 = math.exp %169 : vector<8x64xf32>
    %cst_44 = arith.constant 1.000000e+00 : f32
    %171 = vector.broadcast %cst_44 : f32 to vector<8x64xf32>
    %172 = arith.addf %171, %170 : vector<8x64xf32>
    %173 = arith.divf %171, %172 : vector<8x64xf32>
    %174 = vector.extract_strided_slice %161 {offsets = [0, 128], sizes = [8, 64], strides = [1, 1]} : vector<8x256xf32> to vector<8x64xf32>
    %175 = math.tanh %174 : vector<8x64xf32>
    %176 = vector.extract_strided_slice %161 {offsets = [0, 192], sizes = [8, 64], strides = [1, 1]} : vector<8x256xf32> to vector<8x64xf32>
    %177 = arith.negf %176 : vector<8x64xf32>
    %178 = math.exp %177 : vector<8x64xf32>
    %cst_45 = arith.constant 1.000000e+00 : f32
    %179 = vector.broadcast %cst_45 : f32 to vector<8x64xf32>
    %180 = arith.addf %179, %178 : vector<8x64xf32>
    %181 = arith.divf %179, %180 : vector<8x64xf32>
    %182 = arith.mulf %173, %153 : vector<8x64xf32>
    %183 = arith.mulf %167, %175 : vector<8x64xf32>
    %184 = arith.addf %182, %183 : vector<8x64xf32>
    %185 = math.tanh %184 : vector<8x64xf32>
    %186 = arith.mulf %181, %185 : vector<8x64xf32>
    %c32_46 = arith.constant 32 : index
    %c0_47 = arith.constant 0 : index
    %187 = vector.load %arg1[%c32_46, %c0_47] : memref<64x64xf32, #tpu.memory_space<vmem>>, vector<8x64xf32>
    %188 = arith.subf %184, %153 : vector<8x64xf32>
    %189 = arith.mulf %187, %188 : vector<8x64xf32>
    %190 = arith.addf %153, %189 : vector<8x64xf32>
    %191 = arith.subf %186, %156 : vector<8x64xf32>
    %192 = arith.mulf %187, %191 : vector<8x64xf32>
    %193 = arith.addf %156, %192 : vector<8x64xf32>
    %194 = arith.mulf %187, %186 : vector<8x64xf32>
    %195 = arith.addf %158, %194 : vector<8x64xf32>
    %c40 = arith.constant 40 : index
    %c0_48 = arith.constant 0 : index
    %196 = vector.load %arg10[%c40, %c0_48] : memref<64x256xf32, #tpu.memory_space<vmem>>, vector<8x256xf32>
    %cst_49 = arith.constant dense<0.000000e+00> : vector<8x256xf32>
    %197 = tpu.matmul %193, %7, %cst_49 {dimension_numbers = #tpu.dot_dimension_numbers<[1], [0], [0], [1], [0, 0, 1, 1], [], []>} : vector<8x64xf32>, vector<64x256xf32>, vector<8x256xf32> -> vector<8x256xf32>
    %198 = arith.addf %196, %197 : vector<8x256xf32>
    %199 = vector.extract_strided_slice %198 {offsets = [0, 0], sizes = [8, 64], strides = [1, 1]} : vector<8x256xf32> to vector<8x64xf32>
    %200 = arith.negf %199 : vector<8x64xf32>
    %201 = math.exp %200 : vector<8x64xf32>
    %cst_50 = arith.constant 1.000000e+00 : f32
    %202 = vector.broadcast %cst_50 : f32 to vector<8x64xf32>
    %203 = arith.addf %202, %201 : vector<8x64xf32>
    %204 = arith.divf %202, %203 : vector<8x64xf32>
    %205 = vector.extract_strided_slice %198 {offsets = [0, 64], sizes = [8, 64], strides = [1, 1]} : vector<8x256xf32> to vector<8x64xf32>
    %206 = arith.negf %205 : vector<8x64xf32>
    %207 = math.exp %206 : vector<8x64xf32>
    %cst_51 = arith.constant 1.000000e+00 : f32
    %208 = vector.broadcast %cst_51 : f32 to vector<8x64xf32>
    %209 = arith.addf %208, %207 : vector<8x64xf32>
    %210 = arith.divf %208, %209 : vector<8x64xf32>
    %211 = vector.extract_strided_slice %198 {offsets = [0, 128], sizes = [8, 64], strides = [1, 1]} : vector<8x256xf32> to vector<8x64xf32>
    %212 = math.tanh %211 : vector<8x64xf32>
    %213 = vector.extract_strided_slice %198 {offsets = [0, 192], sizes = [8, 64], strides = [1, 1]} : vector<8x256xf32> to vector<8x64xf32>
    %214 = arith.negf %213 : vector<8x64xf32>
    %215 = math.exp %214 : vector<8x64xf32>
    %cst_52 = arith.constant 1.000000e+00 : f32
    %216 = vector.broadcast %cst_52 : f32 to vector<8x64xf32>
    %217 = arith.addf %216, %215 : vector<8x64xf32>
    %218 = arith.divf %216, %217 : vector<8x64xf32>
    %219 = arith.mulf %210, %190 : vector<8x64xf32>
    %220 = arith.mulf %204, %212 : vector<8x64xf32>
    %221 = arith.addf %219, %220 : vector<8x64xf32>
    %222 = math.tanh %221 : vector<8x64xf32>
    %223 = arith.mulf %218, %222 : vector<8x64xf32>
    %c40_53 = arith.constant 40 : index
    %c0_54 = arith.constant 0 : index
    %224 = vector.load %arg1[%c40_53, %c0_54] : memref<64x64xf32, #tpu.memory_space<vmem>>, vector<8x64xf32>
    %225 = arith.subf %221, %190 : vector<8x64xf32>
    %226 = arith.mulf %224, %225 : vector<8x64xf32>
    %227 = arith.addf %190, %226 : vector<8x64xf32>
    %228 = arith.subf %223, %193 : vector<8x64xf32>
    %229 = arith.mulf %224, %228 : vector<8x64xf32>
    %230 = arith.addf %193, %229 : vector<8x64xf32>
    %231 = arith.mulf %224, %223 : vector<8x64xf32>
    %232 = arith.addf %195, %231 : vector<8x64xf32>
    %c48 = arith.constant 48 : index
    %c0_55 = arith.constant 0 : index
    %233 = vector.load %arg10[%c48, %c0_55] : memref<64x256xf32, #tpu.memory_space<vmem>>, vector<8x256xf32>
    %cst_56 = arith.constant dense<0.000000e+00> : vector<8x256xf32>
    %234 = tpu.matmul %230, %7, %cst_56 {dimension_numbers = #tpu.dot_dimension_numbers<[1], [0], [0], [1], [0, 0, 1, 1], [], []>} : vector<8x64xf32>, vector<64x256xf32>, vector<8x256xf32> -> vector<8x256xf32>
    %235 = arith.addf %233, %234 : vector<8x256xf32>
    %236 = vector.extract_strided_slice %235 {offsets = [0, 0], sizes = [8, 64], strides = [1, 1]} : vector<8x256xf32> to vector<8x64xf32>
    %237 = arith.negf %236 : vector<8x64xf32>
    %238 = math.exp %237 : vector<8x64xf32>
    %cst_57 = arith.constant 1.000000e+00 : f32
    %239 = vector.broadcast %cst_57 : f32 to vector<8x64xf32>
    %240 = arith.addf %239, %238 : vector<8x64xf32>
    %241 = arith.divf %239, %240 : vector<8x64xf32>
    %242 = vector.extract_strided_slice %235 {offsets = [0, 64], sizes = [8, 64], strides = [1, 1]} : vector<8x256xf32> to vector<8x64xf32>
    %243 = arith.negf %242 : vector<8x64xf32>
    %244 = math.exp %243 : vector<8x64xf32>
    %cst_58 = arith.constant 1.000000e+00 : f32
    %245 = vector.broadcast %cst_58 : f32 to vector<8x64xf32>
    %246 = arith.addf %245, %244 : vector<8x64xf32>
    %247 = arith.divf %245, %246 : vector<8x64xf32>
    %248 = vector.extract_strided_slice %235 {offsets = [0, 128], sizes = [8, 64], strides = [1, 1]} : vector<8x256xf32> to vector<8x64xf32>
    %249 = math.tanh %248 : vector<8x64xf32>
    %250 = vector.extract_strided_slice %235 {offsets = [0, 192], sizes = [8, 64], strides = [1, 1]} : vector<8x256xf32> to vector<8x64xf32>
    %251 = arith.negf %250 : vector<8x64xf32>
    %252 = math.exp %251 : vector<8x64xf32>
    %cst_59 = arith.constant 1.000000e+00 : f32
    %253 = vector.broadcast %cst_59 : f32 to vector<8x64xf32>
    %254 = arith.addf %253, %252 : vector<8x64xf32>
    %255 = arith.divf %253, %254 : vector<8x64xf32>
    %256 = arith.mulf %247, %227 : vector<8x64xf32>
    %257 = arith.mulf %241, %249 : vector<8x64xf32>
    %258 = arith.addf %256, %257 : vector<8x64xf32>
    %259 = math.tanh %258 : vector<8x64xf32>
    %260 = arith.mulf %255, %259 : vector<8x64xf32>
    %c48_60 = arith.constant 48 : index
    %c0_61 = arith.constant 0 : index
    %261 = vector.load %arg1[%c48_60, %c0_61] : memref<64x64xf32, #tpu.memory_space<vmem>>, vector<8x64xf32>
    %262 = arith.subf %258, %227 : vector<8x64xf32>
    %263 = arith.mulf %261, %262 : vector<8x64xf32>
    %264 = arith.addf %227, %263 : vector<8x64xf32>
    %265 = arith.subf %260, %230 : vector<8x64xf32>
    %266 = arith.mulf %261, %265 : vector<8x64xf32>
    %267 = arith.addf %230, %266 : vector<8x64xf32>
    %268 = arith.mulf %261, %260 : vector<8x64xf32>
    %269 = arith.addf %232, %268 : vector<8x64xf32>
    %c56 = arith.constant 56 : index
    %c0_62 = arith.constant 0 : index
    %270 = vector.load %arg10[%c56, %c0_62] : memref<64x256xf32, #tpu.memory_space<vmem>>, vector<8x256xf32>
    %cst_63 = arith.constant dense<0.000000e+00> : vector<8x256xf32>
    %271 = tpu.matmul %267, %7, %cst_63 {dimension_numbers = #tpu.dot_dimension_numbers<[1], [0], [0], [1], [0, 0, 1, 1], [], []>} : vector<8x64xf32>, vector<64x256xf32>, vector<8x256xf32> -> vector<8x256xf32>
    %272 = arith.addf %270, %271 : vector<8x256xf32>
    %273 = vector.extract_strided_slice %272 {offsets = [0, 0], sizes = [8, 64], strides = [1, 1]} : vector<8x256xf32> to vector<8x64xf32>
    %274 = arith.negf %273 : vector<8x64xf32>
    %275 = math.exp %274 : vector<8x64xf32>
    %cst_64 = arith.constant 1.000000e+00 : f32
    %276 = vector.broadcast %cst_64 : f32 to vector<8x64xf32>
    %277 = arith.addf %276, %275 : vector<8x64xf32>
    %278 = arith.divf %276, %277 : vector<8x64xf32>
    %279 = vector.extract_strided_slice %272 {offsets = [0, 64], sizes = [8, 64], strides = [1, 1]} : vector<8x256xf32> to vector<8x64xf32>
    %280 = arith.negf %279 : vector<8x64xf32>
    %281 = math.exp %280 : vector<8x64xf32>
    %cst_65 = arith.constant 1.000000e+00 : f32
    %282 = vector.broadcast %cst_65 : f32 to vector<8x64xf32>
    %283 = arith.addf %282, %281 : vector<8x64xf32>
    %284 = arith.divf %282, %283 : vector<8x64xf32>
    %285 = vector.extract_strided_slice %272 {offsets = [0, 128], sizes = [8, 64], strides = [1, 1]} : vector<8x256xf32> to vector<8x64xf32>
    %286 = math.tanh %285 : vector<8x64xf32>
    %287 = vector.extract_strided_slice %272 {offsets = [0, 192], sizes = [8, 64], strides = [1, 1]} : vector<8x256xf32> to vector<8x64xf32>
    %288 = arith.negf %287 : vector<8x64xf32>
    %289 = math.exp %288 : vector<8x64xf32>
    %cst_66 = arith.constant 1.000000e+00 : f32
    %290 = vector.broadcast %cst_66 : f32 to vector<8x64xf32>
    %291 = arith.addf %290, %289 : vector<8x64xf32>
    %292 = arith.divf %290, %291 : vector<8x64xf32>
    %293 = arith.mulf %284, %264 : vector<8x64xf32>
    %294 = arith.mulf %278, %286 : vector<8x64xf32>
    %295 = arith.addf %293, %294 : vector<8x64xf32>
    %296 = math.tanh %295 : vector<8x64xf32>
    %297 = arith.mulf %292, %296 : vector<8x64xf32>
    %c56_67 = arith.constant 56 : index
    %c0_68 = arith.constant 0 : index
    %298 = vector.load %arg1[%c56_67, %c0_68] : memref<64x64xf32, #tpu.memory_space<vmem>>, vector<8x64xf32>
    %299 = arith.mulf %298, %297 : vector<8x64xf32>
    %300 = arith.addf %269, %299 : vector<8x64xf32>
    %c0_69 = arith.constant 0 : index
    %c0_70 = arith.constant 0 : index
    %301 = vector.load %arg5[%c0_69, %c0_70] : memref<64x32xf32, #tpu.memory_space<vmem>>, vector<64x32xf32>
    %cst_71 = arith.constant dense<0.000000e+00> : vector<8x32xf32>
    %302 = tpu.matmul %300, %301, %cst_71 {dimension_numbers = #tpu.dot_dimension_numbers<[1], [0], [0], [1], [0, 0, 1, 1], [], []>} : vector<8x64xf32>, vector<64x32xf32>, vector<8x32xf32> -> vector<8x32xf32>
    %c0_72 = arith.constant 0 : index
    %c0_73 = arith.constant 0 : index
    %303 = vector.load %arg6[%c0_72, %c0_73] : memref<1x32xf32, #tpu.memory_space<vmem>>, vector<1x32xf32>
    %304 = vector.broadcast %303 : vector<1x32xf32> to vector<8x32xf32>
    %305 = arith.addf %302, %304 : vector<8x32xf32>
    %306 = math.tanh %305 : vector<8x32xf32>
    %c0_74 = arith.constant 0 : index
    %c0_75 = arith.constant 0 : index
    %307 = vector.load %arg7[%c0_74, %c0_75] : memref<32x2xf32, #tpu.memory_space<vmem>>, vector<32x2xf32>
    %cst_76 = arith.constant dense<0.000000e+00> : vector<8x2xf32>
    %308 = tpu.matmul %306, %307, %cst_76 {dimension_numbers = #tpu.dot_dimension_numbers<[1], [0], [0], [1], [0, 0, 1, 1], [], []>} : vector<8x32xf32>, vector<32x2xf32>, vector<8x2xf32> -> vector<8x2xf32>
    %c0_77 = arith.constant 0 : index
    %c0_78 = arith.constant 0 : index
    %309 = vector.load %arg8[%c0_77, %c0_78] : memref<1x2xf32, #tpu.memory_space<vmem>>, vector<1x2xf32>
    %310 = vector.broadcast %309 : vector<1x2xf32> to vector<8x2xf32>
    %311 = arith.addf %308, %310 : vector<8x2xf32>
    %c0_79 = arith.constant 0 : index
    %c0_80 = arith.constant 0 : index
    %312 = vector.load %arg9[%c0_79, %c0_80] : memref<8x2xf32, #tpu.memory_space<vmem>>, vector<8x2xf32>
    tpu.vector_store %arg9[%c0_79, %c0_80], %311 {strides = array<i32>} : memref<8x2xf32, #tpu.memory_space<vmem>>, vector<8x2xf32>,
    return
  }
}

</mosaic_0001>

<bundles_post_ra>
// kernel: tpu_custom_call.1
= control target key start
LH: loop header
LB: loop body
LE: loop exit
PB: predicated region body
PF: predicated region fallthrough
CT: control target
= control target key end

     0   :  { %14 = vsyncpa [#allocation4], 0  ;;  %s1811_s30 = smov [#allocation3]   ;;  %s2302_s0 = inlined_call_operand.vmem [shape: f32[64,32], index: 0, kind: input, shape index: {}]   ;;  %s2303_s1 = inlined_call_operand.vmem [shape: f32[64,64], index: 1, kind: input, shape index: {}]   ;;  %s2304_s2 = inlined_call_operand.hbm [shape: f32[32,256], index: 2, kind: input, shape index: {}]   ;;  %s2305_s3 = inlined_call_operand.vmem [shape: f32[1,256], index: 3, kind: input, shape index: {}]   ;;  %s2306_s4 = inlined_call_operand.vmem [shape: f32[64,256], index: 4, kind: input, shape index: {}]   ;;  %s2307_s5 = inlined_call_operand.vmem [shape: f32[64,32], index: 5, kind: input, shape index: {}]   ;;  %s2308_s6 = inlined_call_operand.vmem [shape: f32[1,32], index: 6, kind: input, shape index: {}]   ;;  %s2309_s7 = inlined_call_operand.vmem [shape: f32[32,2], index: 7, kind: input, shape index: {}]   ;;  %s2310_s8 = inlined_call_operand.vmem [shape: f32[1,2], index: 8, kind: input, shape index: {}]   ;;  %s2311_s9 = inlined_call_operand.vmem [shape: f32[8,2], index: 9, kind: output, shape index: {}]  }
   0x1   :  { %s24_s10 = sshll.u32 %s1811_s30, 4  ;;  %s1787_s13 = scalar_lea.hbm %s2304_s2, 1024  ;;  %s25_s10 = int_to_ptr.vmem [resolvable:$true] %s24_s10 }
   0x2   :  { %p1788_p0 = scmp.ne.s32.totalorder %s2304_s2, %s1787_s13  ;;  %p1791_p1 = scmp.lt.u32.totalorder %s1787_s13, %s2304_s2 }
   0x4   :  { %p1793_p2 = pnand %p1791_p1, %p1788_p0 }
   0x6   :  { %1796 = shalt.err (!%p1793_p2)
}
   0x7   :  { %s1797_s18 = scalar_lea.vmem %s25_s10, 1024  ;;  %p1802_p4 = scmp.lt.s32.totalorder %s25_s10, %s25_s10 }
   0x8   :  { %p1798_p3 = scmp.ne.s32.totalorder %s25_s10, %s1797_s18  ;;  %p1803_p5 = scmp.lt.s32.totalorder %s1797_s18, %s1797_s18 }
   0xa   :  { %p1804_p6 = por %p1803_p5, %p1802_p4 }
   0xc   :  { %p1805_p7 = pnand %p1804_p6, %p1798_p3 }
   0xe   :  { %1808 = shalt.err (!%p1805_p7)
}
   0xf   :  { %s1812_s19 = smov 256   ;;  %s1813_s20 = smov 16  }
  0x10   :  { %30 = dma.hbm_to_vmem [thread:$0]  %s2304_s2, 1024, %s25_s10, [#allocation4], %s1812_s19, %s1812_s19, %s1813_s20  }
  0x11   :  { %1809 = dma.done.wait [#allocation4], 1024  }
  0x12   :  { %1810 = vsyncadd [#allocation4], 4294966272  ;;  %v1814_v0 = vmov 0.0   ;;  %v55_v1 = vld [vmem:[#allocation3 + $0x8] sm:$0xff]  ;;  %v57_v2 = vld [vmem:[#allocation3 + $0x18] sm:$0xff]  ;;  %vm74_vm0 = vcmask 261120   ;;  %v64_v51 = vlaneseq }
  0x13   :  { %163 = vmatprep.mubr.f32.mxu1 %v1814_v0  ;;  %555 = vmatprep.mubr.f32.mxu0 %v1814_v0  ;;  %v54_v3 = vld [vmem:[#allocation3] sm:$0xff]  ;;  %v1496_v4 = vpack.c.bf16 %v57_v2, %v55_v1  ;;  %v56_v5 = vld [vmem:[#allocation3 + $0x10] sm:$0xff]  ;;  %v59_v6 = vld [vmem:[#allocation3 + $0x28] sm:$0xff]  ;;  %vm246_vm1 = vcmask 523264   ;;  %vm1817_vm2 = vmmov 0   ;;  %vm1410_vm3 = vcmask 15360  }
  0x14   :  { %v61_v7 = vld [vmem:[#allocation3 + $0x38] sm:$0xff]  ;;  %v1498_v8 = vpack.c.bf16 %v56_v5, %v54_v3  ;;  %v58_v10 = vld [vmem:[#allocation3 + $0x20] sm:$0xff]  ;;  %v60_v11 = vld [vmem:[#allocation3 + $0x30] sm:$0xff]  ;;  %v65_v54 = vshrl.u32 %v64_v51, 7 }
  0x15   :  { %v1500_v9 = vpack.c.bf16 %v61_v7, %v59_v6  ;;  %1497 = vmatprep.subr.bf16.mxu1 %v1496_v4  ;;  %v229_v12 = vld [vmem:[%s2306_s4 + $0x8] sm:$0xff]  ;;  %v231_v13 = vld [vmem:[%s2306_s4 + $0x18] sm:$0xff]  ;;  %v228_v14 = vld [vmem:[%s2306_s4] sm:$0xff]  ;;  %v1502_v15 = vpack.c.bf16 %v60_v11, %v58_v10 }
  0x16   :  { %1499 = vmatpush1.bf16.msra.mxu1 %v1498_v8  ;;  %v1891_v16 = vpack.c.bf16 %v231_v13, %v229_v12  ;;  %v230_v17 = vld [vmem:[%s2306_s4 + $0x10] sm:$0xff]  ;;  %v233_v19 = vld [vmem:[%s2306_s4 + $0x28] sm:$0xff]  ;;  %v235_v20 = vld [vmem:[%s2306_s4 + $0x38] sm:$0xff]  ;;  %v66_v57 = vsub.s32 0, %v65_v54  ;;  %v70_v3 = vsub.s32 1, %v65_v54 }
  0x17   :  { %1501 = vmatprep.subr.bf16.mxu1 %v1500_v9  ;;  %v1896_v18 = vpack.c.bf16 %v230_v17, %v228_v14  ;;  %v1904_v21 = vpack.c.bf16 %v235_v20, %v233_v19  ;;  %v232_v22 = vld [vmem:[%s2306_s4 + $0x20] sm:$0xff]  ;;  %v234_v23 = vld [vmem:[%s2306_s4 + $0x30] sm:$0xff]  ;;  %v237_v25 = vld [vmem:[%s2306_s4 + $0x48] sm:$0xff] }
  0x18   :  { %1537 = vmatprep.subr.bf16.mxu0 %v1891_v16  ;;  %v46_v24 = vld [vmem:[%s2302_s0] sm:$0xff]  ;;  %v239_v26 = vld [vmem:[%s2306_s4 + $0x58] sm:$0xff]  ;;  %v1925_v27 = vpack.c.bf16 %v234_v23, %v232_v22  ;;  %v238_v29 = vld [vmem:[%s2306_s4 + $0x50] sm:$0xff] }
  0x19   :  { %1539 = vmatpush1.bf16.msra.mxu0 %v1896_v18  ;;  %v236_v28 = vld [vmem:[%s2306_s4 + $0x40] sm:$0xff]  ;;  %v1934_v30 = vpack.c.bf16 %v239_v26, %v237_v25  ;;  %v47_v31 = vld [vmem:[%s2302_s0 + $0x8] sm:$0xff]  ;;  %v243_v33 = vld [vmem:[%s2306_s4 + $0x78] sm:$0xff] }
  0x1a   :  { %1503 = vmatpush1.bf16.msra.mxu1 %v1502_v15  ;;  %1541 = vmatprep.subr.bf16.mxu0 %v1904_v21  ;;  %v241_v32 = vld [vmem:[%s2306_s4 + $0x68] sm:$0xff]  ;;  %v1949_v34 = vpack.c.bf16 %v238_v29, %v236_v28  ;;  %v240_v35 = vld [vmem:[%s2306_s4 + $0x60] sm:$0xff]  ;;  %v242_v36 = vld [vmem:[%s2306_s4 + $0x70] sm:$0xff] }
  0x1b   :  { %1505 = vmatprep.subr.bf16.mxu1 %v1891_v16  ;;  %v1959_v37 = vpack.c.bf16 %v243_v33, %v241_v32  ;;  %v48_v38 = vld [vmem:[%s2302_s0 + $0x10] sm:$0xff]  ;;  %v1968_v39 = vpack.c.bf16 %v242_v36, %v240_v35  ;;  %v49_v40 = vld [vmem:[%s2302_s0 + $0x18] sm:$0xff]  ;;  %v50_v41 = vld [vmem:[%s2302_s0 + $0x20] sm:$0xff] }
  0x1c   :  { %v51_v42 = vld [vmem:[%s2302_s0 + $0x28] sm:$0xff]  ;;  %v52_v43 = vld [vmem:[%s2302_s0 + $0x30] sm:$0xff]  ;;  %v53_v44 = vld [vmem:[%s2302_s0 + $0x38] sm:$0xff] }
  0x1d   :  { %1417 = vmatmul.mubr.msk.f32.vlgmr.msra.gmra.mrb[0].mxu1 %vm74_vm0, %v46_v24  ;;  %1543 = vmatpush1.bf16.msra.mxu0 %v1925_v27  ;;  %v62_v58 = vld [vmem:[%s2305_s3] sm:$0x3]  ;;  %s1815_s3 = smov 64  }
  0x1e   :  { %1507 = vmatpush1.bf16.msra.mxu1 %v1896_v18  ;;  %169 = vmatprep.mubr.f32.mxu1 %v1814_v0  ;;  %v2040_v61 = vrot.slane %v62_v58, %v66_v57  ;;  %v2043_v4 = vrot.slane %v62_v58, %v70_v3  ;;  %v345_v23 = vld [vmem:[%s2303_s1] sm:$0xff] }
  0x1f   :  { %1509 = vmatprep.subr.bf16.mxu1 %v1904_v21  ;;  %1545 = vmatprep.subr.bf16.mxu0 %v1934_v30 }
  0x21   :  { %1418 = vmatmul.mubr.msk.f32.gmra.mrb[2].mxu1 %vm74_vm0, %v47_v31  ;;  %1547 = vmatpush1.bf16.msra.mxu0 %v1949_v34 }
  0x22   :  { %175 = vmatprep.mubr.f32.mxu1 %v1814_v0  ;;  %1511 = vmatpush1.bf16.msra.mxu1 %v1925_v27 }
  0x23   :  { %1513 = vmatprep.subr.bf16.mxu1 %v1934_v30  ;;  %1549 = vmatprep.subr.bf16.mxu0 %v1959_v37 }
  0x25   :  { %1419 = vmatmul.mubr.msk.f32.gmra.mrb[4].mxu1 %vm74_vm0, %v48_v38  ;;  %1551 = vmatpush1.bf16.msra.mxu0 %v1968_v39 }
  0x26   :  { %181 = vmatprep.mubr.f32.mxu1 %v1814_v0  ;;  %1515 = vmatpush1.bf16.msra.mxu1 %v1949_v34 }
  0x27   :  { %1517 = vmatprep.subr.bf16.mxu1 %v1959_v37  ;;  %1553 = vmatprep.subr.bf16.mxu0 %v1891_v16 }
  0x29   :  { %1420 = vmatmul.mubr.msk.f32.gmra.mrb[6].mxu1 %vm74_vm0, %v49_v40 }
  0x2a   :  { %187 = vmatprep.mubr.f32.mxu1 %v1814_v0  ;;  %1519 = vmatpush1.bf16.msra.mxu1 %v1968_v39 }
  0x2b   :  { %1521 = vmatprep.subr.bf16.mxu1 %v1891_v16 }
  0x2d   :  { %1421 = vmatmul.mubr.msk.f32.gmra.mrb[8].mxu1 %vm74_vm0, %v50_v41 }
  0x2e   :  { %193 = vmatprep.mubr.f32.mxu1 %v1814_v0 }
  0x31   :  { %1422 = vmatmul.mubr.msk.f32.gmra.mrb[10].mxu1 %vm74_vm0, %v51_v42 }
  0x32   :  { %199 = vmatprep.mubr.f32.mxu1 %v1814_v0 }
  0x35   :  { %1423 = vmatmul.mubr.msk.f32.gmra.mrb[12].mxu1 %vm74_vm0, %v52_v43 }
  0x36   :  { %205 = vmatprep.mubr.f32.mxu1 %v1814_v0 }
  0x39   :  { %1424 = vmatmul.mubr.msk.f32.gmra.mrb[14].mxu1 %vm74_vm0, %v53_v44 }
  0x3a   :  { %314 = vmatprep.mubr.f32.mxu1 %v1814_v0 }
  0x3d   :  { %315 = vmatmul.mubr.f32.vlgmr.msra.gmra.mrb[0].mxu1 %v1814_v0 }
  0x3e   :  { %1523 = vmatpush1.bf16.msra.mxu1 %v1896_v18  ;;  %427 = vmatprep.mubr.f32.mxu1 %v1814_v0 }
  0x3f   :  { %1525 = vmatprep.subr.bf16.mxu1 %v1904_v21 }
  0x42   :  { %1527 = vmatpush1.bf16.msra.mxu1 %v1925_v27 }
  0x43   :  { %1529 = vmatprep.subr.bf16.mxu1 %v1934_v30 }
  0x46   :  { %1531 = vmatpush1.bf16.msra.mxu1 %v1949_v34 }
  0x47   :  { %1533 = vmatprep.subr.bf16.mxu1 %v1959_v37 }
  0x4a   :  { %1535 = vmatpush1.bf16.msra.mxu1 %v1968_v39 }
  0xf8   :  { %v2013_v45 = vpop.f32.mrb[4].mxu1 }
  0xf9   :  { %v2015_v46 = vpop.f32.mrb[5].mxu1 }
  0xfc   :  { %v2017_v47 = vpop.f32.mrb[6].mxu1 }
  0xfd   :  { %v2019_v48 = vpop.f32.mrb[7].mxu1 }
 0x100   :  { %v2021_v49 = vpop.f32.mrb[8].mxu1 }
 0x101   :  { %v2023_v50 = vpop.f32.mrb[9].mxu1 }
 0x104   :  { %v2025_v52 = vpop.f32.mrb[10].mxu1 }
 0x105   :  { %v2027_v53 = vpop.f32.mrb[11].mxu1 }
 0x108   :  { %v2029_v55 = vpop.f32.mrb[12].mxu1 }
 0x109   :  { %v2031_v56 = vpop.f32.mrb[13].mxu1 }
 0x10c   :  { %v2036_v59 = vpop.f32.mrb[14].mxu1 }
 0x10d   :  { %v2038_v60 = vpop.f32.mrb[15].mxu1 }
 0x110   :  { %v316_v62 = vpop.f32.mrb[0].mxu1 }
 0x111   :  { %v1650_v63 = vadd.f32 %v316_v62, %v2040_v61  ;;  %v318_v1 = vpop.f32.mrb[1].mxu1 }
 0x112   :  { %v1651_v5 = vadd.f32 %v318_v1, %v2043_v4 }
 0x113   :  { %v1425_v2 = vmul.f32 -1.442695, %v1650_v63 }
 0x114   :  { %v1426_v11 = vmul.f32 -1.442695, %v1651_v5 }
 0x115   :  { %1689 = vpow2.f32 %v1425_v2 }
 0x116   :  { %1691 = vtanh.f32 %v1651_v5 }
 0x11f   :  { %v1690_v6 = vpop.eup %1689 }
 0x120   :  { %v326_v7 = vadd.f32 1.0, %v1690_v6  ;;  %v1692_v8 = vpop.eup %1691 }
 0x122   :  { %1693 = vrcp.f32 %v326_v7  ;;  %v2070_v7 = vld [vmem:[%s2303_s1 + $0x8] sm:$0xff] }
 0x123   :  { %1695 = vpow2.f32 %v1426_v11 }
 0x12c   :  { %v1694_v9 = vpop.eup %1693 }
 0x12d   :  { %v337_v10 = vmul.f32 %v1694_v9, %v1692_v8  ;;  %v1696_v12 = vpop.eup %1695  ;;  %v336_v14 = vmul.f32 0.0, %v1694_v9 }
 0x12e   :  { %v333_v13 = vadd.f32 1.0, %v1696_v12 }
 0x12f   :  { %339 = vrot.lane.b32.xlu0 %v337_v10, %s1815_s3 }
 0x130   :  { %1697 = vrcp.f32 %v333_v13 }
 0x13a   :  { %v1698_v19 = vpop.eup %1697 }
 0x1a1   :  { %v340_v15 = vpop.permute.xlu0 %339 }
 0x1a2   :  { %v342_v17 = vadd.f32 %v340_v15, %v336_v14  ;;  %v178_v14 = vadd.f32 %v2013_v45, %v2040_v61  ;;  %v180_v15 = vadd.f32 %v2015_v46, %v2043_v4 }
 0x1a4   :  { %1699 = vtanh.f32 %v342_v17  ;;  %347 = vrot.lane.b32.xlu1 %v342_v17, %s1815_s3 }
 0x1ae   :  { %v1700_v20 = vpop.eup %1699 }
 0x1af   :  { %v344_v22 = vmul.f32 %v1700_v20, %v1698_v19 }
 0x1b1   :  { %353 = vrot.lane.b32.xlu0 %v344_v22, %s1815_s3 }
 0x216   :  { %v348_v24 = vpop.permute.xlu1 %347 }
 0x217   :  { %v350_v25 = vmul.f32 %v348_v24, %v345_v23 }
 0x219   :  { %450 = vrot.lane.b32.xlu1 %v350_v25, %s1815_s3 }
 0x223   :  { %v354_v26 = vpop.permute.xlu0 %353 }
 0x224   :  { %v2053_v28 = vmul.f32 %v354_v26, %v345_v23 }
 0x226   :  { %470 = vrot.lane.b32.xlu1 %v2053_v28, %s1815_s3  ;;  %1427 = vmatmul.mubr.msk.f32.vlgmr.msra.gmra.mrb[2].mxu1 %vm246_vm1, %v2053_v28 }
 0x227   :  { %1482 = vmatprep.mubr.msk.f32.mxu1 %vm1817_vm2, %v1814_v0 }
 0x28b   :  { %v451_v51 = vpop.permute.xlu1 %450 }
 0x298   :  { %v471_v5 = vpop.permute.xlu1 %470 }
 0x2f9   :  { %v429_v29 = vpop.f32.mrb[2].mxu1 }
 0x2fa   :  { %v1652_v31 = vadd.f32 %v429_v29, %v2040_v61  ;;  %v431_v32 = vpop.f32.mrb[3].mxu1 }
 0x2fb   :  { %v1653_v35 = vadd.f32 %v431_v32, %v2043_v4 }
 0x2fc   :  { %v1428_v33 = vmul.f32 -1.442695, %v1652_v31 }
 0x2fd   :  { %v1429_v43 = vmul.f32 -1.442695, %v1653_v35 }
 0x2fe   :  { %1701 = vpow2.f32 %v1428_v33 }
 0x2ff   :  { %1703 = vtanh.f32 %v1653_v35 }
 0x308   :  { %v1702_v36 = vpop.eup %1701 }
 0x309   :  { %v439_v38 = vadd.f32 1.0, %v1702_v36  ;;  %v1704_v40 = vpop.eup %1703 }
 0x30b   :  { %1705 = vrcp.f32 %v439_v38 }
 0x30c   :  { %1707 = vpow2.f32 %v1429_v43 }
 0x315   :  { %v1706_v41 = vpop.eup %1705 }
 0x316   :  { %v454_v42 = vmul.f32 %v1706_v41, %v1704_v40  ;;  %v1708_v44 = vpop.eup %1707  ;;  %v453_v57 = vmul.f32 %v1706_v41, %v451_v51 }
 0x317   :  { %v446_v54 = vadd.f32 1.0, %v1708_v44 }
 0x318   :  { %456 = vrot.lane.b32.xlu0 %v454_v42, %s1815_s3 }
 0x319   :  { %1709 = vrcp.f32 %v446_v54  ;;  %v2100_v54 = vld [vmem:[%s2303_s1 + $0x10] sm:$0xff] }
 0x323   :  { %v1710_v1 = vpop.eup %1709 }
 0x38a   :  { %v457_v58 = vpop.permute.xlu0 %456 }
 0x38b   :  { %v459_v62 = vadd.f32 %v457_v58, %v453_v57 }
 0x38d   :  { %1711 = vtanh.f32 %v459_v62  ;;  %v463_v63 = vsub.f32 %v459_v62, %v451_v51 }
 0x38f   :  { %465 = vrot.lane.b32.xlu1 %v463_v63, %s1815_s3 }
 0x397   :  { %v1712_v2 = vpop.eup %1711 }
 0x398   :  { %v2063_v3 = vmul.f32 %v1712_v2, %v1710_v1 }
 0x39a   :  { %v473_v6 = vsub.f32 %v2063_v3, %v471_v5  ;;  %v184_v5 = vadd.f32 %v2017_v47, %v2040_v61 }
 0x39c   :  { %475 = vrot.lane.b32.xlu0 %v473_v6, %s1815_s3  ;;  %v186_v6 = vadd.f32 %v2019_v48, %v2043_v4 }
 0x401   :  { %v466_v8 = vpop.permute.xlu1 %465 }
 0x402   :  { %v468_v9 = vmul.f32 %v466_v8, %v2070_v7 }
 0x404   :  { %v469_v10 = vadd.f32 %v468_v9, %v350_v25 }
 0x406   :  { %578 = vrot.lane.b32.xlu0 %v469_v10, %s1815_s3 }
 0x40e   :  { %v476_v11 = vpop.permute.xlu0 %475 }
 0x40f   :  { %v478_v12 = vmul.f32 %v476_v11, %v2070_v7 }
 0x411   :  { %v479_v13 = vadd.f32 %v478_v12, %v2053_v28 }
 0x413   :  { %598 = vrot.lane.b32.xlu0 %v479_v13, %s1815_s3  ;;  %1430 = vmatmul.mubr.msk.f32.vlgmr.msra.gmra.mrb[0].mxu0 %vm246_vm1, %v479_v13 }
 0x414   :  { %1555 = vmatpush1.bf16.msra.mxu0 %v1896_v18  ;;  %683 = vmatprep.mubr.f32.mxu0 %v1814_v0 }
 0x415   :  { %1557 = vmatprep.subr.bf16.mxu0 %v1904_v21 }
 0x418   :  { %1559 = vmatpush1.bf16.msra.mxu0 %v1925_v27 }
 0x419   :  { %1561 = vmatprep.subr.bf16.mxu0 %v1934_v30 }
 0x41c   :  { %1563 = vmatpush1.bf16.msra.mxu0 %v1949_v34 }
 0x41d   :  { %1565 = vmatprep.subr.bf16.mxu0 %v1959_v37 }
 0x420   :  { %1567 = vmatpush1.bf16.msra.mxu0 %v1968_v39 }
 0x421   :  { %1569 = vmatprep.subr.bf16.mxu0 %v1891_v16 }
 0x478   :  { %v579_v33 = vpop.permute.xlu0 %578 }
 0x485   :  { %v599_v44 = vpop.permute.xlu0 %598 }
 0x4e6   :  { %v557_v17 = vpop.f32.mrb[0].mxu0 }
 0x4e7   :  { %v562_v19 = vadd.f32 %v557_v17, %v178_v14  ;;  %v559_v20 = vpop.f32.mrb[1].mxu0 }
 0x4e8   :  { %v563_v22 = vadd.f32 %v559_v20, %v180_v15 }
 0x4e9   :  { %v1431_v23 = vmul.f32 -1.442695, %v562_v19 }
 0x4ea   :  { %v1432_v32 = vmul.f32 -1.442695, %v563_v22 }
 0x4eb   :  { %1713 = vpow2.f32 %v1431_v23 }
 0x4ec   :  { %1715 = vtanh.f32 %v563_v22 }
 0x4f5   :  { %v1714_v24 = vpop.eup %1713 }
 0x4f6   :  { %v567_v25 = vadd.f32 1.0, %v1714_v24  ;;  %v1716_v26 = vpop.eup %1715 }
 0x4f8   :  { %1717 = vrcp.f32 %v567_v25 }
 0x4f9   :  { %1719 = vpow2.f32 %v1432_v32 }
 0x502   :  { %v1718_v29 = vpop.eup %1717 }
 0x503   :  { %v582_v31 = vmul.f32 %v1718_v29, %v1716_v26  ;;  %v1720_v45 = vpop.eup %1719  ;;  %v581_v35 = vmul.f32 %v1718_v29, %v579_v33 }
 0x504   :  { %v574_v46 = vadd.f32 1.0, %v1720_v45 }
 0x505   :  { %584 = vrot.lane.b32.xlu1 %v582_v31, %s1815_s3 }
 0x506   :  { %1721 = vrcp.f32 %v574_v46  ;;  %v2129_v46 = vld [vmem:[%s2303_s1 + $0x18] sm:$0xff] }
 0x510   :  { %v1722_v41 = vpop.eup %1721 }
 0x577   :  { %v585_v36 = vpop.permute.xlu1 %584 }
 0x578   :  { %v587_v38 = vadd.f32 %v585_v36, %v581_v35 }
 0x57a   :  { %1723 = vtanh.f32 %v587_v38  ;;  %v591_v40 = vsub.f32 %v587_v38, %v579_v33 }
 0x57c   :  { %593 = vrot.lane.b32.xlu0 %v591_v40, %s1815_s3 }
 0x584   :  { %v1724_v42 = vpop.eup %1723 }
 0x585   :  { %v2093_v43 = vmul.f32 %v1724_v42, %v1722_v41 }
 0x587   :  { %v601_v51 = vsub.f32 %v2093_v43, %v599_v44  ;;  %v190_v44 = vadd.f32 %v2021_v49, %v2040_v61 }
 0x589   :  { %603 = vrot.lane.b32.xlu1 %v601_v51, %s1815_s3  ;;  %v192_v51 = vadd.f32 %v2023_v50, %v2043_v4 }
 0x5ee   :  { %v594_v57 = vpop.permute.xlu0 %593 }
 0x5ef   :  { %v596_v58 = vmul.f32 %v594_v57, %v2100_v54 }
 0x5f1   :  { %v597_v62 = vadd.f32 %v596_v58, %v469_v10 }
 0x5f3   :  { %706 = vrot.lane.b32.xlu1 %v597_v62, %s1815_s3 }
 0x5fb   :  { %v604_v63 = vpop.permute.xlu1 %603 }
 0x5fc   :  { %v606_v1 = vmul.f32 %v604_v63, %v2100_v54 }
 0x5fe   :  { %v607_v2 = vadd.f32 %v606_v1, %v479_v13 }
 0x600   :  { %726 = vrot.lane.b32.xlu1 %v607_v2, %s1815_s3  ;;  %1433 = vmatmul.mubr.msk.f32.vlgmr.msra.gmra.mrb[2].mxu0 %vm246_vm1, %v607_v2 }
 0x601   :  { %1571 = vmatpush1.bf16.msra.mxu0 %v1896_v18  ;;  %811 = vmatprep.mubr.f32.mxu0 %v1814_v0 }
 0x602   :  { %1573 = vmatprep.subr.bf16.mxu0 %v1904_v21 }
 0x605   :  { %1575 = vmatpush1.bf16.msra.mxu0 %v1925_v27 }
 0x606   :  { %1577 = vmatprep.subr.bf16.mxu0 %v1934_v30 }
 0x609   :  { %1579 = vmatpush1.bf16.msra.mxu0 %v1949_v34 }
 0x60a   :  { %1581 = vmatprep.subr.bf16.mxu0 %v1959_v37 }
 0x60d   :  { %1583 = vmatpush1.bf16.msra.mxu0 %v1968_v39 }
 0x60e   :  { %1585 = vmatprep.subr.bf16.mxu0 %v1891_v16 }
 0x665   :  { %v707_v22 = vpop.permute.xlu1 %706 }
 0x672   :  { %v727_v45 = vpop.permute.xlu1 %726 }
 0x6d3   :  { %v685_v8 = vpop.f32.mrb[2].mxu0 }
 0x6d4   :  { %v690_v9 = vadd.f32 %v685_v8, %v184_v5  ;;  %v687_v10 = vpop.f32.mrb[3].mxu0 }
 0x6d5   :  { %v691_v11 = vadd.f32 %v687_v10, %v186_v6 }
 0x6d6   :  { %v1434_v12 = vmul.f32 -1.442695, %v690_v9 }
 0x6d7   :  { %v1435_v20 = vmul.f32 -1.442695, %v691_v11 }
 0x6d8   :  { %1725 = vpow2.f32 %v1434_v12 }
 0x6d9   :  { %1727 = vtanh.f32 %v691_v11 }
 0x6e2   :  { %v1726_v13 = vpop.eup %1725 }
 0x6e3   :  { %v695_v14 = vadd.f32 1.0, %v1726_v13  ;;  %v1728_v15 = vpop.eup %1727 }
 0x6e5   :  { %1729 = vrcp.f32 %v695_v14 }
 0x6e6   :  { %1731 = vpow2.f32 %v1435_v20 }
 0x6ef   :  { %v1730_v17 = vpop.eup %1729 }
 0x6f0   :  { %v710_v19 = vmul.f32 %v1730_v17, %v1728_v15  ;;  %v1732_v47 = vpop.eup %1731  ;;  %v709_v23 = vmul.f32 %v1730_v17, %v707_v22 }
 0x6f1   :  { %v702_v48 = vadd.f32 1.0, %v1732_v47 }
 0x6f2   :  { %712 = vrot.lane.b32.xlu0 %v710_v19, %s1815_s3 }
 0x6f3   :  { %1733 = vrcp.f32 %v702_v48  ;;  %v2158_v48 = vld [vmem:[%s2303_s1 + $0x20] sm:$0xff] }
 0x6fd   :  { %v1734_v29 = vpop.eup %1733 }
 0x764   :  { %v713_v24 = vpop.permute.xlu0 %712 }
 0x765   :  { %v715_v25 = vadd.f32 %v713_v24, %v709_v23 }
 0x767   :  { %1735 = vtanh.f32 %v715_v25  ;;  %v719_v26 = vsub.f32 %v715_v25, %v707_v22 }
 0x769   :  { %721 = vrot.lane.b32.xlu1 %v719_v26, %s1815_s3 }
 0x771   :  { %v1736_v31 = vpop.eup %1735 }
 0x772   :  { %v2122_v32 = vmul.f32 %v1736_v31, %v1734_v29 }
 0x774   :  { %v729_v33 = vsub.f32 %v2122_v32, %v727_v45  ;;  %v196_v45 = vadd.f32 %v2025_v52, %v2040_v61 }
 0x776   :  { %731 = vrot.lane.b32.xlu0 %v729_v33, %s1815_s3  ;;  %v198_v33 = vadd.f32 %v2027_v53, %v2043_v4 }
 0x7db   :  { %v722_v35 = vpop.permute.xlu1 %721 }
 0x7dc   :  { %v724_v36 = vmul.f32 %v722_v35, %v2129_v46 }
 0x7de   :  { %v725_v38 = vadd.f32 %v724_v36, %v597_v62 }
 0x7e0   :  { %834 = vrot.lane.b32.xlu0 %v725_v38, %s1815_s3 }
 0x7e8   :  { %v732_v40 = vpop.permute.xlu0 %731 }
 0x7e9   :  { %v734_v41 = vmul.f32 %v732_v40, %v2129_v46 }
 0x7eb   :  { %v735_v42 = vadd.f32 %v734_v41, %v607_v2 }
 0x7ed   :  { %1436 = vmatmul.mubr.msk.f32.vlgmr.msra.gmra.mrb[4].mxu0 %vm246_vm1, %v735_v42  ;;  %854 = vrot.lane.b32.xlu0 %v735_v42, %s1815_s3 }
 0x7ee   :  { %1587 = vmatpush1.bf16.msra.mxu0 %v1896_v18  ;;  %939 = vmatprep.mubr.f32.mxu0 %v1814_v0 }
 0x7ef   :  { %1589 = vmatprep.subr.bf16.mxu0 %v1904_v21 }
 0x7f2   :  { %1591 = vmatpush1.bf16.msra.mxu0 %v1925_v27 }
 0x7f3   :  { %1593 = vmatprep.subr.bf16.mxu0 %v1934_v30 }
 0x7f6   :  { %1595 = vmatpush1.bf16.msra.mxu0 %v1949_v34 }
 0x7f7   :  { %1597 = vmatprep.subr.bf16.mxu0 %v1959_v37 }
 0x7fa   :  { %1599 = vmatpush1.bf16.msra.mxu0 %v1968_v39 }
 0x7fb   :  { %1601 = vmatprep.subr.bf16.mxu0 %v1891_v16 }
 0x852   :  { %v835_v11 = vpop.permute.xlu0 %834 }
 0x85f   :  { %v855_v47 = vpop.permute.xlu0 %854 }
 0x8c0   :  { %v813_v57 = vpop.f32.mrb[4].mxu0 }
 0x8c1   :  { %v818_v58 = vadd.f32 %v813_v57, %v190_v44  ;;  %v815_v62 = vpop.f32.mrb[5].mxu0 }
 0x8c2   :  { %v819_v63 = vadd.f32 %v815_v62, %v192_v51 }
 0x8c3   :  { %v1437_v1 = vmul.f32 -1.442695, %v818_v58 }
 0x8c4   :  { %v1438_v10 = vmul.f32 -1.442695, %v819_v63 }
 0x8c5   :  { %1737 = vpow2.f32 %v1437_v1 }
 0x8c6   :  { %1739 = vtanh.f32 %v819_v63 }
 0x8cf   :  { %v1738_v2 = vpop.eup %1737 }
 0x8d0   :  { %v823_v5 = vadd.f32 1.0, %v1738_v2  ;;  %v1740_v6 = vpop.eup %1739 }
 0x8d2   :  { %1741 = vrcp.f32 %v823_v5 }
 0x8d3   :  { %1743 = vpow2.f32 %v1438_v10 }
 0x8dc   :  { %v1742_v8 = vpop.eup %1741 }
 0x8dd   :  { %v838_v9 = vmul.f32 %v1742_v8, %v1740_v6  ;;  %v1744_v49 = vpop.eup %1743  ;;  %v837_v12 = vmul.f32 %v1742_v8, %v835_v11 }
 0x8de   :  { %v830_v50 = vadd.f32 1.0, %v1744_v49 }
 0x8df   :  { %840 = vrot.lane.b32.xlu1 %v838_v9, %s1815_s3 }
 0x8e0   :  { %1745 = vrcp.f32 %v830_v50 }
 0x8ea   :  { %v1746_v17 = vpop.eup %1745 }
 0x951   :  { %v841_v13 = vpop.permute.xlu1 %840 }
 0x952   :  { %v843_v14 = vadd.f32 %v841_v13, %v837_v12 }
 0x954   :  { %1747 = vtanh.f32 %v843_v14  ;;  %v847_v15 = vsub.f32 %v843_v14, %v835_v11  ;;  %v2187_v11 = vld [vmem:[%s2303_s1 + $0x28] sm:$0xff] }
 0x956   :  { %849 = vrot.lane.b32.xlu0 %v847_v15, %s1815_s3 }
 0x95e   :  { %v1748_v19 = vpop.eup %1747 }
 0x95f   :  { %v2151_v20 = vmul.f32 %v1748_v19, %v1746_v17  ;;  %v202_v19 = vadd.f32 %v2029_v55, %v2040_v61 }
 0x961   :  { %v857_v22 = vsub.f32 %v2151_v20, %v855_v47 }
 0x963   :  { %859 = vrot.lane.b32.xlu1 %v857_v22, %s1815_s3 }
 0x9c8   :  { %v850_v23 = vpop.permute.xlu0 %849 }
 0x9c9   :  { %v852_v24 = vmul.f32 %v850_v23, %v2158_v48 }
 0x9cb   :  { %v853_v25 = vadd.f32 %v852_v24, %v725_v38 }
 0x9cd   :  { %962 = vrot.lane.b32.xlu1 %v853_v25, %s1815_s3 }
 0x9d5   :  { %v860_v26 = vpop.permute.xlu1 %859 }
 0x9d6   :  { %v862_v29 = vmul.f32 %v860_v26, %v2158_v48 }
 0x9d8   :  { %v863_v31 = vadd.f32 %v862_v29, %v735_v42 }
 0x9da   :  { %982 = vrot.lane.b32.xlu1 %v863_v31, %s1815_s3  ;;  %1439 = vmatmul.mubr.msk.f32.vlgmr.msra.gmra.mrb[6].mxu0 %vm246_vm1, %v863_v31 }
 0x9db   :  { %1603 = vmatpush1.bf16.msra.mxu0 %v1896_v18  ;;  %1067 = vmatprep.mubr.f32.mxu0 %v1814_v0 }
 0x9dc   :  { %1605 = vmatprep.subr.bf16.mxu0 %v1904_v21 }
 0x9df   :  { %1607 = vmatpush1.bf16.msra.mxu0 %v1925_v27 }
 0x9e0   :  { %1609 = vmatprep.subr.bf16.mxu0 %v1934_v30 }
 0x9e3   :  { %1611 = vmatpush1.bf16.msra.mxu0 %v1949_v34 }
 0x9e4   :  { %1613 = vmatprep.subr.bf16.mxu0 %v1959_v37 }
 0x9e7   :  { %1615 = vmatpush1.bf16.msra.mxu0 %v1968_v39 }
 0x9e8   :  { %1617 = vmatprep.subr.bf16.mxu0 %v1891_v16 }
 0xa3f   :  { %v963_v62 = vpop.permute.xlu1 %962 }
 0xa4c   :  { %v983_v10 = vpop.permute.xlu1 %982 }
 0xaad   :  { %v941_v35 = vpop.f32.mrb[6].mxu0 }
 0xaae   :  { %v946_v36 = vadd.f32 %v941_v35, %v196_v45  ;;  %v943_v38 = vpop.f32.mrb[7].mxu0 }
 0xaaf   :  { %v947_v40 = vadd.f32 %v943_v38, %v198_v33 }
 0xab0   :  { %v1440_v41 = vmul.f32 -1.442695, %v946_v36 }
 0xab1   :  { %v1441_v16 = vmul.f32 -1.442695, %v947_v40 }
 0xab2   :  { %1749 = vpow2.f32 %v1440_v41 }
 0xab3   :  { %1751 = vtanh.f32 %v947_v40 }
 0xabc   :  { %v1750_v42 = vpop.eup %1749 }
 0xabd   :  { %v951_v44 = vadd.f32 1.0, %v1750_v42  ;;  %v1752_v51 = vpop.eup %1751  ;;  %v2212_v42 = vld [vmem:[%s2303_s1 + $0x30] sm:$0xff] }
 0xabf   :  { %1753 = vrcp.f32 %v951_v44 }
 0xac0   :  { %1755 = vpow2.f32 %v1441_v16 }
 0xac9   :  { %v1754_v57 = vpop.eup %1753 }
 0xaca   :  { %v966_v58 = vmul.f32 %v1754_v57, %v1752_v51  ;;  %v1756_v52 = vpop.eup %1755  ;;  %v965_v63 = vmul.f32 %v1754_v57, %v963_v62 }
 0xacb   :  { %v958_v53 = vadd.f32 1.0, %v1756_v52 }
 0xacc   :  { %968 = vrot.lane.b32.xlu0 %v966_v58, %s1815_s3 }
 0xacd   :  { %1757 = vrcp.f32 %v958_v53  ;;  %v210_v53 = vadd.f32 %v2038_v60, %v2043_v4  ;;  %v1238_v60 = vld [vmem:[%s2307_s5 + $0x8] sm:$0xff] }
 0xad7   :  { %v1758_v6 = vpop.eup %1757 }
 0xb3e   :  { %v969_v1 = vpop.permute.xlu0 %968 }
 0xb3f   :  { %v971_v2 = vadd.f32 %v969_v1, %v965_v63 }
 0xb41   :  { %1759 = vtanh.f32 %v971_v2  ;;  %v975_v5 = vsub.f32 %v971_v2, %v963_v62  ;;  %v208_v62 = vadd.f32 %v2036_v59, %v2040_v61  ;;  %v1237_v59 = vld [vmem:[%s2307_s5] sm:$0xff]  ;;  %v1239_v61 = vld [vmem:[%s2307_s5 + $0x10] sm:$0xff] }
 0xb43   :  { %977 = vrot.lane.b32.xlu1 %v975_v5, %s1815_s3 }
 0xb4b   :  { %v1760_v8 = vpop.eup %1759 }
 0xb4c   :  { %v2180_v9 = vmul.f32 %v1760_v8, %v1758_v6 }
 0xb4e   :  { %v985_v49 = vsub.f32 %v2180_v9, %v983_v10 }
 0xb50   :  { %987 = vrot.lane.b32.xlu0 %v985_v49, %s1815_s3  ;;  %v1633_v49 = vpack.c.bf16 %v1238_v60, %v1237_v59 }
 0xbb5   :  { %v978_v50 = vpop.permute.xlu1 %977 }
 0xbb6   :  { %v980_v12 = vmul.f32 %v978_v50, %v2187_v11  ;;  %v1240_v50 = vld [vmem:[%s2307_s5 + $0x18] sm:$0xff] }
 0xbb8   :  { %v981_v13 = vadd.f32 %v980_v12, %v853_v25  ;;  %v1636_v12 = vpack.c.bf16 %v1240_v50, %v1239_v61 }
 0xbba   :  { %1090 = vrot.lane.b32.xlu0 %v981_v13, %s1815_s3 }
 0xbc2   :  { %v988_v14 = vpop.permute.xlu0 %987 }
 0xbc3   :  { %v990_v15 = vmul.f32 %v988_v14, %v2187_v11  ;;  %v1242_v14 = vld [vmem:[%s2307_s5 + $0x28] sm:$0xff] }
 0xbc5   :  { %v991_v17 = vadd.f32 %v990_v15, %v863_v31 }
 0xbc7   :  { %1442 = vmatmul.mubr.msk.f32.vlgmr.msra.gmra.mrb[8].mxu0 %vm246_vm1, %v991_v17  ;;  %1110 = vrot.lane.b32.xlu0 %v991_v17, %s1815_s3 }
 0xbc8   :  { %1619 = vmatpush1.bf16.msra.mxu0 %v1896_v18  ;;  %1195 = vmatprep.mubr.f32.mxu0 %v1814_v0  ;;  %v204_v18 = vadd.f32 %v2031_v56, %v2043_v4  ;;  %v1816_v4 = vmov 0.0|0.0  }
 0xbc9   :  { %1621 = vmatprep.subr.bf16.mxu0 %v1904_v21  ;;  %1632 = vmatprep.subr.bf16.mxu1 %v1816_v4 }
 0xbca   :  { %1634 = vmatpush3.bf16.msra.mxu1 %v1633_v49 }
 0xbcb   :  { %1635 = vmatprep.subr.bf16.mxu1 %v1816_v4 }
 0xbcc   :  { %1623 = vmatpush1.bf16.msra.mxu0 %v1925_v27 }
 0xbcd   :  { %1625 = vmatprep.subr.bf16.mxu0 %v1934_v30 }
 0xbce   :  { %1637 = vmatpush3.bf16.msra.mxu1 %v1636_v12 }
 0xbcf   :  { %1638 = vmatprep.subr.bf16.mxu1 %v1816_v4 }
 0xbd0   :  { %1627 = vmatpush1.bf16.msra.mxu0 %v1949_v34 }
 0xbd1   :  { %1629 = vmatprep.subr.bf16.mxu0 %v1959_v37 }
 0xbd4   :  { %1631 = vmatpush1.bf16.msra.mxu0 %v1968_v39 }
 0xc2c   :  { %v1091_v26 = vpop.permute.xlu0 %1090 }
 0xc39   :  { %v1111_v40 = vpop.permute.xlu0 %1110 }
 0xc9a   :  { %v1069_v47 = vpop.f32.mrb[8].mxu0 }
 0xc9b   :  { %v1074_v22 = vadd.f32 %v1069_v47, %v202_v19  ;;  %v1071_v23 = vpop.f32.mrb[9].mxu0 }
 0xc9c   :  { %v1075_v21 = vadd.f32 %v1071_v23, %v204_v18 }
 0xc9d   :  { %v1443_v24 = vmul.f32 -1.442695, %v1074_v22 }
 0xc9e   :  { %v1444_v39 = vmul.f32 -1.442695, %v1075_v21 }
 0xc9f   :  { %1761 = vpow2.f32 %v1443_v24 }
 0xca0   :  { %1763 = vtanh.f32 %v1075_v21  ;;  %v1244_v21 = vld [vmem:[%s2307_s5 + $0x38] sm:$0xff] }
 0xca9   :  { %v1762_v27 = vpop.eup %1761 }
 0xcaa   :  { %v1079_v30 = vadd.f32 1.0, %v1762_v27  ;;  %v1764_v34 = vpop.eup %1763 }
 0xcac   :  { %1765 = vrcp.f32 %v1079_v30 }
 0xcad   :  { %1767 = vpow2.f32 %v1444_v39 }
 0xcb6   :  { %v1766_v37 = vpop.eup %1765 }
 0xcb7   :  { %v1094_v25 = vmul.f32 %v1766_v37, %v1764_v34  ;;  %v1768_v55 = vpop.eup %1767  ;;  %v1093_v29 = vmul.f32 %v1766_v37, %v1091_v26 }
 0xcb8   :  { %v1086_v56 = vadd.f32 1.0, %v1768_v55 }
 0xcb9   :  { %1096 = vrot.lane.b32.xlu1 %v1094_v25, %s1815_s3 }
 0xcba   :  { %1769 = vrcp.f32 %v1086_v56 }
 0xcc4   :  { %v1770_v35 = vpop.eup %1769 }
 0xd2b   :  { %v1097_v31 = vpop.permute.xlu1 %1096 }
 0xd2c   :  { %v1099_v45 = vadd.f32 %v1097_v31, %v1093_v29 }
 0xd2e   :  { %1771 = vtanh.f32 %v1099_v45  ;;  %v1103_v33 = vsub.f32 %v1099_v45, %v1091_v26 }
 0xd30   :  { %1105 = vrot.lane.b32.xlu0 %v1103_v33, %s1815_s3 }
 0xd38   :  { %v1772_v36 = vpop.eup %1771 }
 0xd39   :  { %v1101_v38 = vmul.f32 %v1772_v36, %v1770_v35 }
 0xd3b   :  { %v1113_v41 = vsub.f32 %v1101_v38, %v1111_v40 }
 0xd3d   :  { %1115 = vrot.lane.b32.xlu1 %v1113_v41, %s1815_s3 }
 0xda2   :  { %v1106_v44 = vpop.permute.xlu0 %1105 }
 0xda3   :  { %v1108_v51 = vmul.f32 %v1106_v44, %v2212_v42 }
 0xda5   :  { %v1109_v57 = vadd.f32 %v1108_v51, %v981_v13  ;;  %v1241_v13 = vld [vmem:[%s2307_s5 + $0x20] sm:$0xff] }
 0xda6   :  { %v1639_v15 = vpack.c.bf16 %v1242_v14, %v1241_v13 }
 0xda7   :  { %1218 = vrot.lane.b32.xlu1 %v1109_v57, %s1815_s3 }
 0xda8   :  { %1640 = vmatpush3.bf16.msra.mxu1 %v1639_v15 }
 0xda9   :  { %1641 = vmatprep.subr.bf16.mxu1 %v1816_v4 }
 0xdab   :  { %481 = vrot.lane.b32.xlu1 %v2063_v3, %s1815_s3 }
 0xdaf   :  { %737 = vrot.lane.b32.xlu1 %v2122_v32, %s1815_s3  ;;  %v1116_v58 = vpop.permute.xlu1 %1115 }
 0xdb0   :  { %v1118_v16 = vmul.f32 %v1116_v58, %v2212_v42 }
 0xdb2   :  { %v1119_v52 = vadd.f32 %v1118_v16, %v991_v17  ;;  %v1329_v16 = vld [vmem:[%s2309_s7 + $0x18] sm:$0xff] }
 0xdb3   :  { %993 = vrot.lane.b32.xlu1 %v2180_v9, %s1815_s3 }
 0xdb4   :  { %1445 = vmatmul.mubr.msk.f32.vlgmr.msra.gmra.mrb[10].mxu0 %vm246_vm1, %v1119_v52 }
 0xe19   :  { %v1219_v19 = vpop.permute.xlu1 %1218 }
 0xe1d   :  { %v482_v37 = vpop.permute.xlu1 %481 }
 0xe1e   :  { %v484_v39 = vmul.f32 %v482_v37, %v2070_v7 }
 0xe20   :  { %v485_v26 = vadd.f32 %v484_v39, %v2053_v28  ;;  %v1230_v28 = vld [vmem:[%s2303_s1 + $0x38] sm:$0xff] }
 0xe21   :  { %v738_v56 = vpop.permute.xlu1 %737 }
 0xe22   :  { %v740_v45 = vmul.f32 %v738_v56, %v2129_v46  ;;  %v1326_v46 = vld [vmem:[%s2309_s7] sm:$0xff] }
 0xe25   :  { %v994_v36 = vpop.permute.xlu1 %993 }
 0xe26   :  { %v996_v41 = vmul.f32 %v994_v36, %v2187_v11  ;;  %v1328_v11 = vld [vmem:[%s2309_s7 + $0x10] sm:$0xff] }
 0xe27   :  { %v1648_v52 = vpack.c.bf16 %v1329_v16, %v1328_v11 }
 0xe87   :  { %v1197_v63 = vpop.f32.mrb[10].mxu0 }
 0xe88   :  { %v1202_v3 = vadd.f32 %v1197_v63, %v208_v62  ;;  %v1199_v1 = vpop.f32.mrb[11].mxu0 }
 0xe89   :  { %v1203_v2 = vadd.f32 %v1199_v1, %v210_v53  ;;  %v1450_v1 = vld [vmem:[%s2310_s8] ss:$0 sm:$0xff] }
 0xe8a   :  { %v1446_v32 = vmul.f32 -1.442695, %v1202_v3 }
 0xe8c   :  { %1773 = vpow2.f32 %v1446_v32 }
 0xe8d   :  { %1775 = vtanh.f32 %v1203_v2 }
 0xe96   :  { %v1774_v5 = vpop.eup %1773 }
 0xe97   :  { %v1207_v6 = vadd.f32 1.0, %v1774_v5  ;;  %v1776_v8 = vpop.eup %1775 }
 0xe99   :  { %1777 = vrcp.f32 %v1207_v6 }
 0xea3   :  { %v1778_v9 = vpop.eup %1777 }
 0xea4   :  { %v1222_v10 = vmul.f32 %v1778_v9, %v1776_v8  ;;  %v1221_v47 = vmul.f32 %v1778_v9, %v1219_v19 }
 0xea6   :  { %1224 = vrot.lane.b32.xlu0 %v1222_v10, %s1815_s3 }
 0xeaa   :  { %609 = vrot.lane.b32.xlu0 %v2093_v43, %s1815_s3  ;;  %v1447_v43 = vmul.f32 -1.442695, %v1203_v2 }
 0xeac   :  { %1779 = vpow2.f32 %v1447_v43 }
 0xeae   :  { %865 = vrot.lane.b32.xlu0 %v2151_v20, %s1815_s3  ;;  %v1243_v20 = vld [vmem:[%s2307_s5 + $0x30] sm:$0xff] }
 0xeaf   :  { %v1642_v24 = vpack.c.bf16 %v1244_v21, %v1243_v20 }
 0xeb1   :  { %1643 = vmatpush3.bf16.msra.mxu1 %v1642_v24 }
 0xeb2   :  { %1121 = vrot.lane.b32.xlu0 %v1101_v38, %s1815_s3  ;;  %1644 = vmatprep.subr.bf16.mxu1 %v1816_v4 }
 0xeb6   :  { %v1780_v17 = vpop.eup %1779 }
 0xeb7   :  { %v1214_v18 = vadd.f32 1.0, %v1780_v17 }
 0xeb9   :  { %1781 = vrcp.f32 %v1214_v18 }
 0xec3   :  { %v1782_v27 = vpop.eup %1781 }
 0xf18   :  { %v1225_v22 = vpop.permute.xlu0 %1224 }
 0xf19   :  { %v1227_v23 = vadd.f32 %v1225_v22, %v1221_v47 }
 0xf1b   :  { %1783 = vtanh.f32 %v1227_v23 }
 0xf1c   :  { %v610_v25 = vpop.permute.xlu0 %609 }
 0xf1d   :  { %v612_v55 = vmul.f32 %v610_v25, %v2100_v54 }
 0xf1f   :  { %v613_v29 = vadd.f32 %v612_v55, %v485_v26 }
 0xf20   :  { %v866_v31 = vpop.permute.xlu0 %865 }
 0xf21   :  { %v741_v33 = vadd.f32 %v740_v45, %v613_v29  ;;  %v868_v35 = vmul.f32 %v866_v31, %v2158_v48  ;;  %v1327_v48 = vld [vmem:[%s2309_s7 + $0x8] sm:$0xff] }
 0xf23   :  { %v869_v38 = vadd.f32 %v868_v35, %v741_v33 }
 0xf24   :  { %v1122_v40 = vpop.permute.xlu0 %1121 }
 0xf25   :  { %v1784_v30 = vpop.eup %1783  ;;  %v997_v44 = vadd.f32 %v996_v41, %v869_v38  ;;  %v1124_v7 = vmul.f32 %v1122_v40, %v2212_v42  ;;  %v1645_v42 = vpack.c.bf16 %v1327_v48, %v1326_v46 }
 0xf26   :  { %v1229_v34 = vmul.f32 %v1784_v30, %v1782_v27 }
 0xf27   :  { %v1125_v51 = vadd.f32 %v1124_v7, %v997_v44 }
 0xf28   :  { %1232 = vrot.lane.b32.xlu1 %v1229_v34, %s1815_s3 }
 0xf9a   :  { %v1233_v54 = vpop.permute.xlu1 %1232 }
 0xf9b   :  { %v1235_v57 = vmul.f32 %v1233_v54, %v1230_v28 }
 0xf9d   :  { %v1236_v58 = vadd.f32 %v1235_v57, %v1125_v51 }
 0xf9f   :  { %1483 = vmatmul.mubr.msk.f32.vlgmr.msra.gmra.mrb[16].mxu1 %vm246_vm1, %v1236_v58 }
 0xfa0   :  { %1493 = vmatprep.mubr.msk.f32.mxu1 %vm1817_vm2, %v1814_v0  ;;  %1646 = vmatpush3.bf16.msra.mxu1 %v1645_v42  ;;  %v1448_v0 = vld [vmem:[%s2308_s6] ss:$0 sm:$0xff] }
 0xfa1   :  { %1647 = vmatprep.subr.bf16.mxu1 %v1816_v4 }
 0xfa4   :  { %1649 = vmatpush3.bf16.msra.mxu1 %v1648_v52 }
0x1072   :  { %v1321_v62 = vpop.f32.mrb[16].mxu1 }
0x1073   :  { %v1322_v53 = vadd.f32 %v1448_v0, %v1321_v62  ;;  %v1484_v63 = vpop.f32.mrb[17].mxu1 }
0x1075   :  { %1785 = vtanh.f32 %v1322_v53 }
0x107f   :  { %v1786_v3 = vpop.eup %1785 }
0x1080   :  { %1494 = vmatmul.mubr.msk.f32.vlgmr.msra.gmra.mrb[18].mxu1 %vm74_vm0, %v1786_v3 }
0x1153   :  { %v1406_v2 = vpop.f32.mrb[18].mxu1 }
0x1154   :  { %v1407_v32 = vadd.f32 %v1450_v1, %v1406_v2  ;;  %v1495_v5 = vpop.f32.mrb[19].mxu1 }
0x1156   :  { %1411 = vst.msk [vmem:[%s2311_s9] sm:$0xff] %vm1410_vm3, %v1407_v32 }
0x1157   :  { %1416 = vsyncpa [#allocation4], 1 }

</bundles_post_ra>
